<compile_context>
chip_gen: v7x
topology: tpu7x:2x2x1
jax: 0.10.0
libtpu: 0.0.40
codegen_flags: <defaults>
</compile_context>

<pallas_src>
import functools

import jax
import jax.numpy as jnp
from jax import lax
from jax.experimental import pallas as pl
from jax.experimental.pallas import tpu as pltpu


def _conv_lstm_kernel(x_ref, h_ref, c_ref, w_ref, b_ref,
                      h_out_ref, c_out_ref, comb_ref, patches_ref,
                      *, H, W, K, Nb, base):
    """Nb batch elements per grid step.

    x_ref      : (Nb, Cin, H*W)  f32   input (also the residual)
    h_ref      : (Nb, Ch,  H*W)  f32   previous hidden state
    c_ref      : (Nb, Ch,  H*W)  f32   previous cell state
    w_ref      : (4*Ch, K*K*Ct)  bf16  conv weight, tap-major / channel-minor
    b_ref      : (4*Ch, 1)       f32   conv bias (column vector)
    h_out_ref  : (Nb, Ch, H*W)
    c_out_ref  : (Nb, Ch, H*W)
    comb_ref   : (Ct, Wflat)     f32   VMEM scratch, row-padded flattened image
    patches_ref: (K*K*Ct, H*W)   bf16  VMEM scratch, im2col matrix (matmul RHS)
    """
    Cin = x_ref.shape[1]
    Ch = h_ref.shape[1]
    Ct = Cin + Ch
    HW = H * W
    p = K // 2
    halo = p * W + p                       # columns read outside the interior

    # --- zero only the halo strips the taps actually read (cheap, per step,
    #     and independent of any cross-step scratch state -> megacore safe) ---
    comb_ref[:, base - halo:base] = jnp.zeros((Ct, halo), jnp.float32)
    comb_ref[:, base + HW:base + HW + halo] = jnp.zeros((Ct, halo), jnp.float32)

    # --- K distinct horizontal-wrap masks, hoisted out of the tap loops ------
    col = lax.broadcasted_iota(jnp.int32, (1, HW), 1) % W
    masks = [None] * K
    for ox in range(-p, p + 1):
        if ox != 0:
            masks[ox + p] = ((col >= -ox) & (col < W - ox)).astype(jnp.bfloat16)

    for nb in range(Nb):
        # ---- assemble zero-padded concat([x, h]) interior in VMEM -----------
        comb_ref[0:Cin, base:base + HW] = x_ref[nb]
        comb_ref[Cin:Ct, base:base + HW] = h_ref[nb]

        # ---- im2col: each tap stored straight into the patches scratch ------
        for dy in range(K):
            for dx in range(K):
                ox = dx - p
                start = base + (dy - p) * W + ox          # static slice start
                tap = comb_ref[:, start:start + HW].astype(jnp.bfloat16)
                if ox != 0:
                    tap = tap * masks[ox + p]             # mask after bf16 cast
                r = (dy * K + dx) * Ct
                patches_ref[r:r + Ct, :] = tap

        # ---- single wide-contraction MXU matmul + bias -----------------------
        acc = jnp.dot(w_ref[...], patches_ref[...],
                      preferred_element_type=jnp.float32)  # (4*Ch, HW) f32
        acc = acc + b_ref[...]                             # lane broadcast

        # ---- gates (same order as torch.split on the conv output) -----------
        i = jax.nn.sigmoid(acc[0 * Ch:1 * Ch])
        f = jax.nn.sigmoid(acc[1 * Ch:2 * Ch])
        g = jnp.tanh(acc[2 * Ch:3 * Ch])
        o = jax.nn.sigmoid(acc[3 * Ch:4 * Ch])

        c_next = f * c_ref[nb] + i * g
        h_next = o * jnp.tanh(c_next) + x_ref[nb]          # residual (Cin==Ch)

        h_out_ref[nb] = h_next.astype(h_out_ref.dtype)
        c_out_ref[nb] = c_next.astype(c_out_ref.dtype)


def _pick_batch_block(n, max_nb=8):
    """Largest divisor of n (<= max_nb) that still leaves >= 2 grid steps."""
    if n <= 1:
        return 1
    best = 1
    for d in range(1, min(n, max_nb) + 1):
        if n % d == 0 and n // d >= 2:
            best = d
    return best


def conv_lstm_cell(x, h_prev, c_prev, weight, bias, kernel_size):
    """Pallas ConvLSTM cell.  All arrays NCHW (like PyTorch).

      x      : (N, C_in, H, W)
      h_prev : (N, C_h, H, W)
      c_prev : (N, C_h, H, W)
      weight : (4*C_h, C_in + C_h, K, K)   nn.Conv2d weight layout (OIHW)
      bias   : (4*C_h,)
    Returns (h_next, c_next) in NCHW.
    """
    N, Cin, H, W = x.shape
    Ch = h_prev.shape[1]
    assert Cin == Ch, "h_next = o*tanh(c_next) + x requires C_in == C_hidden"
    K = kernel_size
    assert K % 2 == 1, "padding = K//2 only matches the reference for odd K"
    p = K // 2
    Ct = Cin + Ch
    Cg = 4 * Ch
    HW = H * W

    # Lane-aligned interior: choose the leading guard so base % 128 == 0.
    guard = p + ((-(p + p * W)) % 128)
    base = guard + p * W
    Wflat = ((base + HW + p * W + p) + 127) // 128 * 128

    Nb = _pick_batch_block(N)
    grid = (N // Nb,)

    # Free (contiguous) reshapes only — no transposes, no HBM concat/pad.
    x_flat = x.reshape(N, Cin, HW)
    h_flat = h_prev.reshape(N, Ch, HW)
    c_flat = c_prev.reshape(N, Ch, HW)

    # (O, I, K, K) -> (O, K, K, I) -> (O, K*K*I): tap-major / channel-minor
    # columns to match the in-kernel patch construction.  bf16 for MXU.
    w_mat = jnp.transpose(weight, (0, 2, 3, 1)).reshape(Cg, K * K * Ct)
    w_mat = w_mat.astype(jnp.bfloat16)
    b_col = bias.reshape(Cg, 1).astype(jnp.float32)

    kernel = functools.partial(_conv_lstm_kernel,
                               H=H, W=W, K=K, Nb=Nb, base=base)

    # ---- VMEM budget derived from tile sizes (double-buffered I/O) ----------
    tile_bytes = (Nb * (Cin + 2 * Ch) * HW * 4      # x, h, c inputs
                  + Nb * 2 * Ch * HW * 4            # h, c outputs
                  + Cg * K * K * Ct * 2 + Cg * 4)   # weights (bf16) + bias
    scratch_bytes = Ct * Wflat * 4 + K * K * Ct * HW * 2
    need = 2 * tile_bytes + scratch_bytes
    try:
        phys_vmem = pltpu.get_tpu_info().vmem_capacity_bytes
    except Exception:
        phys_vmem = 64 * 1024 * 1024                 # conservative (v7x per-TC)
    cap = (phys_vmem * 3) // 4
    vmem_limit = int(min(max(2 * need + (4 << 20), 16 << 20), cap))

    grid_spec = pltpu.PrefetchScalarGridSpec(
        num_scalar_prefetch=0,
        grid=grid,
        in_specs=[
            pl.BlockSpec((Nb, Cin, HW), lambda n: (n, 0, 0)),   # x
            pl.BlockSpec((Nb, Ch, HW), lambda n: (n, 0, 0)),    # h_prev
            pl.BlockSpec((Nb, Ch, HW), lambda n: (n, 0, 0)),    # c_prev
            pl.BlockSpec((Cg, K * K * Ct), lambda n: (0, 0)),   # weights
            pl.BlockSpec((Cg, 1), lambda n: (0, 0)),            # bias
        ],
        out_specs=[
            pl.BlockSpec((Nb, Ch, HW), lambda n: (n, 0, 0)),
            pl.BlockSpec((Nb, Ch, HW), lambda n: (n, 0, 0)),
        ],
        scratch_shapes=[
            pltpu.VMEM((Ct, Wflat), jnp.float32),               # padded concat
            pltpu.VMEM((K * K * Ct, HW), jnp.bfloat16),         # im2col RHS
        ],
    )

    h_next, c_next = pl.pallas_call(
        kernel,
        out_shape=(
            jax.ShapeDtypeStruct((N, Ch, HW), x.dtype),
            jax.ShapeDtypeStruct((N, Ch, HW), x.dtype),
        ),
        grid_spec=grid_spec,
        compiler_params=pltpu.CompilerParams(
            dimension_semantics=("parallel",),
            vmem_limit_bytes=vmem_limit,
        ),
    )(x_flat, h_flat, c_flat, w_mat, b_col)

    return h_next.reshape(N, Ch, H, W), c_next.reshape(N, Ch, H, W)


def _reference(x, h_prev, c_prev, weight, bias, kernel_size):
    """Pure-JAX f32 reference matching the PyTorch module (NCHW)."""
    p = kernel_size // 2
    combined = jnp.concatenate([x, h_prev], axis=1)
    conv_out = lax.conv_general_dilated(
        combined, weight, window_strides=(1, 1),
        padding=[(p, p), (p, p)],
        dimension_numbers=("NCHW", "OIHW", "NCHW"))
    conv_out = conv_out + bias.reshape(1, -1, 1, 1)
    i, f, g, o = jnp.split(conv_out, 4, axis=1)
    i, f, o = jax.nn.sigmoid(i), jax.nn.sigmoid(f), jax.nn.sigmoid(o)
    g = jnp.tanh(g)
    c_next = f * c_prev + i * g
    h_next = o * jnp.tanh(c_next) + x
    return h_next, c_next


if __name__ == "__main__":
    # Small deterministic problem.  C_in == C_hidden is required by the
    # residual "+ x" in the module's forward.  N=4 -> Nb=2, 2 parallel steps.
    N, Cin, Ch, H, W, K = 4, 8, 8, 16, 16, 3
    key = jax.random.PRNGKey(0)
    k_x, k_h, k_c, k_w, k_b = jax.random.split(key, 5)

    x = jax.random.normal(k_x, (N, Cin, H, W), jnp.float32)
    h_prev = jax.random.normal(k_h, (N, Ch, H, W), jnp.float32)
    c_prev = jax.random.normal(k_c, (N, Ch, H, W), jnp.float32)
    weight = 0.05 * jax.random.normal(k_w, (4 * Ch, Cin + Ch, K, K), jnp.float32)
    bias = 0.1 * jax.random.normal(k_b, (4 * Ch,), jnp.float32)

    h_next, c_next = conv_lstm_cell(x, h_prev, c_prev, weight, bias, K)
    jax.block_until_ready((h_next, c_next))

    h_ref, c_ref = _reference(x, h_prev, c_prev, weight, bias, K)
    # bf16 MXU operands vs f32 reference -> tolerance ~1e-2.
    assert jnp.allclose(h_next, h_ref, atol=2e-2, rtol=2e-2), \
        float(jnp.max(jnp.abs(h_next - h_ref)))
    assert jnp.allclose(c_next, c_ref, atol=2e-2, rtol=2e-2), \
        float(jnp.max(jnp.abs(c_next - c_ref)))

    print("KERNEL_OK")
</pallas_src>

<mosaic_0001>
module attributes {stable_mosaic.version = 11 : i64} {
  func.func @_conv_lstm_kernel(%arg0: i32, %arg1: memref<2x8x256xf32, #tpu.memory_space<vmem>>, %arg2: memref<2x8x256xf32, #tpu.memory_space<vmem>>, %arg3: memref<2x8x256xf32, #tpu.memory_space<vmem>>, %arg4: memref<32x144xbf16, #tpu.memory_space<vmem>>, %arg5: memref<32x1xf32, #tpu.memory_space<vmem>>, %arg6: memref<2x8x256xf32, #tpu.memory_space<vmem>>, %arg7: memref<2x8x256xf32, #tpu.memory_space<vmem>>, %arg8: memref<16x512xf32, #tpu.memory_space<vmem>>, %arg9: memref<144x256xbf16, #tpu.memory_space<vmem>>) attributes {dimension_semantics = [#tpu.dimension_semantics<parallel>], iteration_bounds = array<i64: 2>, scalar_prefetch = 0 : i64, scratch_operands = 2 : i64, tpu.core_type = #tpu.core_type<tc>, window_params = [{transform_indices = @transform_0, window_bounds = array<i64: 2, 8, 256>}, {transform_indices = @transform_1, window_bounds = array<i64: 2, 8, 256>}, {transform_indices = @transform_2, window_bounds = array<i64: 2, 8, 256>}, {pipeline_mode = #tpu.pipeline_mode<synchronous>, transform_indices = @transform_3, window_bounds = array<i64: 32, 144>}, {pipeline_mode = #tpu.pipeline_mode<synchronous>, transform_indices = @transform_4, window_bounds = array<i64: 32, 1>}, {transform_indices = @transform_5, window_bounds = array<i64: 2, 8, 256>}, {transform_indices = @transform_6, window_bounds = array<i64: 2, 8, 256>}]} {
    %cst = arith.constant 0.000000e+00 : f32
    %0 = vector.broadcast %cst : f32 to vector<16x17xf32>
    %c0 = arith.constant 0 : index
    %c111 = arith.constant 111 : index
    %1 = vector.load %arg8[%c0, %c111] : memref<16x512xf32, #tpu.memory_space<vmem>>, vector<16x17xf32>
    tpu.vector_store %arg8[%c0, %c111], %0 {strides = array<i32>} : memref<16x512xf32, #tpu.memory_space<vmem>>, vector<16x17xf32>,
    %cst_0 = arith.constant 0.000000e+00 : f32
    %2 = vector.broadcast %cst_0 : f32 to vector<16x17xf32>
    %c0_1 = arith.constant 0 : index
    %c384 = arith.constant 384 : index
    %3 = vector.load %arg8[%c0_1, %c384] : memref<16x512xf32, #tpu.memory_space<vmem>>, vector<16x17xf32>
    tpu.vector_store %arg8[%c0_1, %c384], %2 {strides = array<i32>} : memref<16x512xf32, #tpu.memory_space<vmem>>, vector<16x17xf32>,
    %4 = tpu.iota {dimensions = array<i32: 1>} : vector<1x256xi32>
    %c16_i32 = arith.constant 16 : i32
    %c0_i32 = arith.constant 0 : i32
    %5 = arith.cmpi eq, %c16_i32, %c0_i32 : i32
    %c1_i32 = arith.constant 1 : i32
    %6 = arith.select %5, %c1_i32, %c16_i32 : i32
    %7 = vector.broadcast %6 : i32 to vector<1x256xi32>
    %8 = arith.remsi %4, %7 : vector<1x256xi32>
    %c0_i32_2 = arith.constant 0 : i32
    %9 = vector.broadcast %c0_i32_2 : i32 to vector<1x256xi32>
    %10 = arith.cmpi ne, %8, %9 : vector<1x256xi32>
    %c0_i32_3 = arith.constant 0 : i32
    %11 = vector.broadcast %c0_i32_3 : i32 to vector<1x256xi32>
    %12 = arith.cmpi slt, %8, %11 : vector<1x256xi32>
    %c0_i32_4 = arith.constant 0 : i32
    %13 = arith.cmpi slt, %6, %c0_i32_4 : i32
    %14 = vector.broadcast %13 : i1 to vector<1x256xi1>
    %15 = vector.broadcast %14 : vector<1x256xi1> to vector<1x256xi1>
    %16 = arith.xori %12, %15 : vector<1x256xi1>
    %17 = arith.andi %16, %10 : vector<1x256xi1>
    %18 = vector.broadcast %6 : i32 to vector<1x256xi32>
    %19 = arith.addi %8, %18 : vector<1x256xi32>
    %20 = arith.select %17, %19, %8 : vector<1x256xi1>, vector<1x256xi32>
    %c1_i32_5 = arith.constant 1 : i32
    %21 = vector.broadcast %c1_i32_5 : i32 to vector<1x256xi32>
    %22 = arith.cmpi sge, %20, %21 : vector<1x256xi32>
    %c17_i32 = arith.constant 17 : i32
    %23 = vector.broadcast %c17_i32 : i32 to vector<1x256xi32>
    %24 = arith.cmpi slt, %20, %23 : vector<1x256xi32>
    %25 = arith.andi %22, %24 : vector<1x256xi1>
    %26 = arith.extui %25 : vector<1x256xi1> to vector<1x256xi32>
    %27 = arith.sitofp %26 : vector<1x256xi32> to vector<1x256xf32>
    %28 = arith.truncf %27 : vector<1x256xf32> to vector<1x256xbf16>
    %c-1_i32 = arith.constant -1 : i32
    %29 = vector.broadcast %c-1_i32 : i32 to vector<1x256xi32>
    %30 = arith.cmpi sge, %20, %29 : vector<1x256xi32>
    %c15_i32 = arith.constant 15 : i32
    %31 = vector.broadcast %c15_i32 : i32 to vector<1x256xi32>
    %32 = arith.cmpi slt, %20, %31 : vector<1x256xi32>
    %33 = arith.andi %30, %32 : vector<1x256xi1>
    %34 = arith.extui %33 : vector<1x256xi1> to vector<1x256xi32>
    %35 = arith.sitofp %34 : vector<1x256xi32> to vector<1x256xf32>
    %36 = arith.truncf %35 : vector<1x256xf32> to vector<1x256xbf16>
    %c0_6 = arith.constant 0 : index
    %c0_7 = arith.constant 0 : index
    %c0_8 = arith.constant 0 : index
    %37 = vector.load %arg1[%c0_6, %c0_7, %c0_8] : memref<2x8x256xf32, #tpu.memory_space<vmem>>, vector<1x8x256xf32>
    %38 = vector.shape_cast %37 : vector<1x8x256xf32> to vector<8x256xf32>
    %c0_9 = arith.constant 0 : index
    %c128 = arith.constant 128 : index
    %39 = vector.load %arg8[%c0_9, %c128] : memref<16x512xf32, #tpu.memory_space<vmem>>, vector<8x256xf32>
    tpu.vector_store %arg8[%c0_9, %c128], %38 {strides = array<i32>} : memref<16x512xf32, #tpu.memory_space<vmem>>, vector<8x256xf32>,
    %c0_10 = arith.constant 0 : index
    %c0_11 = arith.constant 0 : index
    %c0_12 = arith.constant 0 : index
    %40 = vector.load %arg2[%c0_10, %c0_11, %c0_12] : memref<2x8x256xf32, #tpu.memory_space<vmem>>, vector<1x8x256xf32>
    %41 = vector.shape_cast %40 : vector<1x8x256xf32> to vector<8x256xf32>
    %c8 = arith.constant 8 : index
    %c128_13 = arith.constant 128 : index
    %42 = vector.load %arg8[%c8, %c128_13] : memref<16x512xf32, #tpu.memory_space<vmem>>, vector<8x256xf32>
    tpu.vector_store %arg8[%c8, %c128_13], %41 {strides = array<i32>} : memref<16x512xf32, #tpu.memory_space<vmem>>, vector<8x256xf32>,
    %c0_14 = arith.constant 0 : index
    %c111_15 = arith.constant 111 : index
    %43 = vector.load %arg8[%c0_14, %c111_15] : memref<16x512xf32, #tpu.memory_space<vmem>>, vector<16x256xf32>
    %44 = arith.truncf %43 : vector<16x256xf32> to vector<16x256xbf16>
    %45 = vector.broadcast %28 : vector<1x256xbf16> to vector<16x256xbf16>
    %46 = arith.mulf %44, %45 : vector<16x256xbf16>
    %c0_16 = arith.constant 0 : index
    %c0_17 = arith.constant 0 : index
    %47 = vector.load %arg9[%c0_16, %c0_17] : memref<144x256xbf16, #tpu.memory_space<vmem>>, vector<16x256xbf16>
    tpu.vector_store %arg9[%c0_16, %c0_17], %46 {strides = array<i32>} : memref<144x256xbf16, #tpu.memory_space<vmem>>, vector<16x256xbf16>,
    %c0_18 = arith.constant 0 : index
    %c112 = arith.constant 112 : index
    %48 = vector.load %arg8[%c0_18, %c112] : memref<16x512xf32, #tpu.memory_space<vmem>>, vector<16x256xf32>
    %49 = arith.truncf %48 : vector<16x256xf32> to vector<16x256xbf16>
    %c16 = arith.constant 16 : index
    %c0_19 = arith.constant 0 : index
    %50 = vector.load %arg9[%c16, %c0_19] : memref<144x256xbf16, #tpu.memory_space<vmem>>, vector<16x256xbf16>
    tpu.vector_store %arg9[%c16, %c0_19], %49 {strides = array<i32>} : memref<144x256xbf16, #tpu.memory_space<vmem>>, vector<16x256xbf16>,
    %c0_20 = arith.constant 0 : index
    %c113 = arith.constant 113 : index
    %51 = vector.load %arg8[%c0_20, %c113] : memref<16x512xf32, #tpu.memory_space<vmem>>, vector<16x256xf32>
    %52 = arith.truncf %51 : vector<16x256xf32> to vector<16x256xbf16>
    %53 = vector.broadcast %36 : vector<1x256xbf16> to vector<16x256xbf16>
    %54 = arith.mulf %52, %53 : vector<16x256xbf16>
    %c32 = arith.constant 32 : index
    %c0_21 = arith.constant 0 : index
    %55 = vector.load %arg9[%c32, %c0_21] : memref<144x256xbf16, #tpu.memory_space<vmem>>, vector<16x256xbf16>
    tpu.vector_store %arg9[%c32, %c0_21], %54 {strides = array<i32>} : memref<144x256xbf16, #tpu.memory_space<vmem>>, vector<16x256xbf16>,
    %c0_22 = arith.constant 0 : index
    %c127 = arith.constant 127 : index
    %56 = vector.load %arg8[%c0_22, %c127] : memref<16x512xf32, #tpu.memory_space<vmem>>, vector<16x256xf32>
    %57 = arith.truncf %56 : vector<16x256xf32> to vector<16x256xbf16>
    %58 = vector.broadcast %28 : vector<1x256xbf16> to vector<16x256xbf16>
    %59 = arith.mulf %57, %58 : vector<16x256xbf16>
    %c48 = arith.constant 48 : index
    %c0_23 = arith.constant 0 : index
    %60 = vector.load %arg9[%c48, %c0_23] : memref<144x256xbf16, #tpu.memory_space<vmem>>, vector<16x256xbf16>
    tpu.vector_store %arg9[%c48, %c0_23], %59 {strides = array<i32>} : memref<144x256xbf16, #tpu.memory_space<vmem>>, vector<16x256xbf16>,
    %c0_24 = arith.constant 0 : index
    %c128_25 = arith.constant 128 : index
    %61 = vector.load %arg8[%c0_24, %c128_25] : memref<16x512xf32, #tpu.memory_space<vmem>>, vector<16x256xf32>
    %62 = arith.truncf %61 : vector<16x256xf32> to vector<16x256xbf16>
    %c64 = arith.constant 64 : index
    %c0_26 = arith.constant 0 : index
    %63 = vector.load %arg9[%c64, %c0_26] : memref<144x256xbf16, #tpu.memory_space<vmem>>, vector<16x256xbf16>
    tpu.vector_store %arg9[%c64, %c0_26], %62 {strides = array<i32>} : memref<144x256xbf16, #tpu.memory_space<vmem>>, vector<16x256xbf16>,
    %c0_27 = arith.constant 0 : index
    %c129 = arith.constant 129 : index
    %64 = vector.load %arg8[%c0_27, %c129] : memref<16x512xf32, #tpu.memory_space<vmem>>, vector<16x256xf32>
    %65 = arith.truncf %64 : vector<16x256xf32> to vector<16x256xbf16>
    %66 = vector.broadcast %36 : vector<1x256xbf16> to vector<16x256xbf16>
    %67 = arith.mulf %65, %66 : vector<16x256xbf16>
    %c80 = arith.constant 80 : index
    %c0_28 = arith.constant 0 : index
    %68 = vector.load %arg9[%c80, %c0_28] : memref<144x256xbf16, #tpu.memory_space<vmem>>, vector<16x256xbf16>
    tpu.vector_store %arg9[%c80, %c0_28], %67 {strides = array<i32>} : memref<144x256xbf16, #tpu.memory_space<vmem>>, vector<16x256xbf16>,
    %c0_29 = arith.constant 0 : index
    %c143 = arith.constant 143 : index
    %69 = vector.load %arg8[%c0_29, %c143] : memref<16x512xf32, #tpu.memory_space<vmem>>, vector<16x256xf32>
    %70 = arith.truncf %69 : vector<16x256xf32> to vector<16x256xbf16>
    %71 = vector.broadcast %28 : vector<1x256xbf16> to vector<16x256xbf16>
    %72 = arith.mulf %70, %71 : vector<16x256xbf16>
    %c96 = arith.constant 96 : index
    %c0_30 = arith.constant 0 : index
    %73 = vector.load %arg9[%c96, %c0_30] : memref<144x256xbf16, #tpu.memory_space<vmem>>, vector<16x256xbf16>
    tpu.vector_store %arg9[%c96, %c0_30], %72 {strides = array<i32>} : memref<144x256xbf16, #tpu.memory_space<vmem>>, vector<16x256xbf16>,
    %c0_31 = arith.constant 0 : index
    %c144 = arith.constant 144 : index
    %74 = vector.load %arg8[%c0_31, %c144] : memref<16x512xf32, #tpu.memory_space<vmem>>, vector<16x256xf32>
    %75 = arith.truncf %74 : vector<16x256xf32> to vector<16x256xbf16>
    %c112_32 = arith.constant 112 : index
    %c0_33 = arith.constant 0 : index
    %76 = vector.load %arg9[%c112_32, %c0_33] : memref<144x256xbf16, #tpu.memory_space<vmem>>, vector<16x256xbf16>
    tpu.vector_store %arg9[%c112_32, %c0_33], %75 {strides = array<i32>} : memref<144x256xbf16, #tpu.memory_space<vmem>>, vector<16x256xbf16>,
    %c0_34 = arith.constant 0 : index
    %c145 = arith.constant 145 : index
    %77 = vector.load %arg8[%c0_34, %c145] : memref<16x512xf32, #tpu.memory_space<vmem>>, vector<16x256xf32>
    %78 = arith.truncf %77 : vector<16x256xf32> to vector<16x256xbf16>
    %79 = vector.broadcast %36 : vector<1x256xbf16> to vector<16x256xbf16>
    %80 = arith.mulf %78, %79 : vector<16x256xbf16>
    %c128_35 = arith.constant 128 : index
    %c0_36 = arith.constant 0 : index
    %81 = vector.load %arg9[%c128_35, %c0_36] : memref<144x256xbf16, #tpu.memory_space<vmem>>, vector<16x256xbf16>
    tpu.vector_store %arg9[%c128_35, %c0_36], %80 {strides = array<i32>} : memref<144x256xbf16, #tpu.memory_space<vmem>>, vector<16x256xbf16>,
    %c0_37 = arith.constant 0 : index
    %c0_38 = arith.constant 0 : index
    %82 = vector.load %arg4[%c0_37, %c0_38] : memref<32x144xbf16, #tpu.memory_space<vmem>>, vector<32x144xbf16>
    %c0_39 = arith.constant 0 : index
    %c0_40 = arith.constant 0 : index
    %83 = vector.load %arg9[%c0_39, %c0_40] : memref<144x256xbf16, #tpu.memory_space<vmem>>, vector<144x256xbf16>
    %cst_41 = arith.constant dense<0.000000e+00> : vector<32x256xf32>
    %84 = tpu.matmul %82, %83, %cst_41 {dimension_numbers = #tpu.dot_dimension_numbers<[1], [0], [0], [1], [0, 0, 1, 1], [], []>} : vector<32x144xbf16>, vector<144x256xbf16>, vector<32x256xf32> -> vector<32x256xf32>
    %c0_42 = arith.constant 0 : index
    %c0_43 = arith.constant 0 : index
    %85 = vector.load %arg5[%c0_42, %c0_43] : memref<32x1xf32, #tpu.memory_space<vmem>>, vector<32x1xf32>
    %86 = vector.broadcast %85 : vector<32x1xf32> to vector<32x256xf32>
    %87 = arith.addf %84, %86 : vector<32x256xf32>
    %88 = vector.extract_strided_slice %87 {offsets = [0, 0], sizes = [8, 256], strides = [1, 1]} : vector<32x256xf32> to vector<8x256xf32>
    %89 = arith.negf %88 : vector<8x256xf32>
    %90 = math.exp %89 : vector<8x256xf32>
    %cst_44 = arith.constant 1.000000e+00 : f32
    %91 = vector.broadcast %cst_44 : f32 to vector<8x256xf32>
    %92 = arith.addf %91, %90 : vector<8x256xf32>
    %93 = arith.divf %91, %92 : vector<8x256xf32>
    %94 = vector.extract_strided_slice %87 {offsets = [8, 0], sizes = [8, 256], strides = [1, 1]} : vector<32x256xf32> to vector<8x256xf32>
    %95 = arith.negf %94 : vector<8x256xf32>
    %96 = math.exp %95 : vector<8x256xf32>
    %cst_45 = arith.constant 1.000000e+00 : f32
    %97 = vector.broadcast %cst_45 : f32 to vector<8x256xf32>
    %98 = arith.addf %97, %96 : vector<8x256xf32>
    %99 = arith.divf %97, %98 : vector<8x256xf32>
    %100 = vector.extract_strided_slice %87 {offsets = [16, 0], sizes = [8, 256], strides = [1, 1]} : vector<32x256xf32> to vector<8x256xf32>
    %101 = math.tanh %100 : vector<8x256xf32>
    %102 = vector.extract_strided_slice %87 {offsets = [24, 0], sizes = [8, 256], strides = [1, 1]} : vector<32x256xf32> to vector<8x256xf32>
    %103 = arith.negf %102 : vector<8x256xf32>
    %104 = math.exp %103 : vector<8x256xf32>
    %cst_46 = arith.constant 1.000000e+00 : f32
    %105 = vector.broadcast %cst_46 : f32 to vector<8x256xf32>
    %106 = arith.addf %105, %104 : vector<8x256xf32>
    %107 = arith.divf %105, %106 : vector<8x256xf32>
    %c0_47 = arith.constant 0 : index
    %c0_48 = arith.constant 0 : index
    %c0_49 = arith.constant 0 : index
    %108 = vector.load %arg3[%c0_47, %c0_48, %c0_49] : memref<2x8x256xf32, #tpu.memory_space<vmem>>, vector<1x8x256xf32>
    %109 = vector.shape_cast %108 : vector<1x8x256xf32> to vector<8x256xf32>
    %110 = arith.mulf %99, %109 : vector<8x256xf32>
    %111 = arith.mulf %93, %101 : vector<8x256xf32>
    %112 = arith.addf %110, %111 : vector<8x256xf32>
    %113 = math.tanh %112 : vector<8x256xf32>
    %114 = arith.mulf %107, %113 : vector<8x256xf32>
    %c0_50 = arith.constant 0 : index
    %c0_51 = arith.constant 0 : index
    %c0_52 = arith.constant 0 : index
    %115 = vector.load %arg1[%c0_50, %c0_51, %c0_52] : memref<2x8x256xf32, #tpu.memory_space<vmem>>, vector<1x8x256xf32>
    %116 = vector.shape_cast %115 : vector<1x8x256xf32> to vector<8x256xf32>
    %117 = arith.addf %114, %116 : vector<8x256xf32>
    %c0_53 = arith.constant 0 : index
    %c0_54 = arith.constant 0 : index
    %c0_55 = arith.constant 0 : index
    %118 = vector.load %arg6[%c0_53, %c0_54, %c0_55] : memref<2x8x256xf32, #tpu.memory_space<vmem>>, vector<1x8x256xf32>
    %119 = vector.shape_cast %118 : vector<1x8x256xf32> to vector<8x256xf32>
    %120 = vector.shape_cast %117 : vector<8x256xf32> to vector<1x8x256xf32>
    tpu.vector_store %arg6[%c0_53, %c0_54, %c0_55], %120 {strides = array<i32>} : memref<2x8x256xf32, #tpu.memory_space<vmem>>, vector<1x8x256xf32>,
    %c0_56 = arith.constant 0 : index
    %c0_57 = arith.constant 0 : index
    %c0_58 = arith.constant 0 : index
    %121 = vector.load %arg7[%c0_56, %c0_57, %c0_58] : memref<2x8x256xf32, #tpu.memory_space<vmem>>, vector<1x8x256xf32>
    %122 = vector.shape_cast %121 : vector<1x8x256xf32> to vector<8x256xf32>
    %123 = vector.shape_cast %112 : vector<8x256xf32> to vector<1x8x256xf32>
    tpu.vector_store %arg7[%c0_56, %c0_57, %c0_58], %123 {strides = array<i32>} : memref<2x8x256xf32, #tpu.memory_space<vmem>>, vector<1x8x256xf32>,
    %c1 = arith.constant 1 : index
    %c0_59 = arith.constant 0 : index
    %c0_60 = arith.constant 0 : index
    %124 = vector.load %arg1[%c1, %c0_59, %c0_60] : memref<2x8x256xf32, #tpu.memory_space<vmem>>, vector<1x8x256xf32>
    %125 = vector.shape_cast %124 : vector<1x8x256xf32> to vector<8x256xf32>
    %c0_61 = arith.constant 0 : index
    %c128_62 = arith.constant 128 : index
    %126 = vector.load %arg8[%c0_61, %c128_62] : memref<16x512xf32, #tpu.memory_space<vmem>>, vector<8x256xf32>
    tpu.vector_store %arg8[%c0_61, %c128_62], %125 {strides = array<i32>} : memref<16x512xf32, #tpu.memory_space<vmem>>, vector<8x256xf32>,
    %c1_63 = arith.constant 1 : index
    %c0_64 = arith.constant 0 : index
    %c0_65 = arith.constant 0 : index
    %127 = vector.load %arg2[%c1_63, %c0_64, %c0_65] : memref<2x8x256xf32, #tpu.memory_space<vmem>>, vector<1x8x256xf32>
    %128 = vector.shape_cast %127 : vector<1x8x256xf32> to vector<8x256xf32>
    %c8_66 = arith.constant 8 : index
    %c128_67 = arith.constant 128 : index
    %129 = vector.load %arg8[%c8_66, %c128_67] : memref<16x512xf32, #tpu.memory_space<vmem>>, vector<8x256xf32>
    tpu.vector_store %arg8[%c8_66, %c128_67], %128 {strides = array<i32>} : memref<16x512xf32, #tpu.memory_space<vmem>>, vector<8x256xf32>,
    %c0_68 = arith.constant 0 : index
    %c111_69 = arith.constant 111 : index
    %130 = vector.load %arg8[%c0_68, %c111_69] : memref<16x512xf32, #tpu.memory_space<vmem>>, vector<16x256xf32>
    %131 = arith.truncf %130 : vector<16x256xf32> to vector<16x256xbf16>
    %132 = vector.broadcast %28 : vector<1x256xbf16> to vector<16x256xbf16>
    %133 = arith.mulf %131, %132 : vector<16x256xbf16>
    %c0_70 = arith.constant 0 : index
    %c0_71 = arith.constant 0 : index
    %134 = vector.load %arg9[%c0_70, %c0_71] : memref<144x256xbf16, #tpu.memory_space<vmem>>, vector<16x256xbf16>
    tpu.vector_store %arg9[%c0_70, %c0_71], %133 {strides = array<i32>} : memref<144x256xbf16, #tpu.memory_space<vmem>>, vector<16x256xbf16>,
    %c0_72 = arith.constant 0 : index
    %c112_73 = arith.constant 112 : index
    %135 = vector.load %arg8[%c0_72, %c112_73] : memref<16x512xf32, #tpu.memory_space<vmem>>, vector<16x256xf32>
    %136 = arith.truncf %135 : vector<16x256xf32> to vector<16x256xbf16>
    %c16_74 = arith.constant 16 : index
    %c0_75 = arith.constant 0 : index
    %137 = vector.load %arg9[%c16_74, %c0_75] : memref<144x256xbf16, #tpu.memory_space<vmem>>, vector<16x256xbf16>
    tpu.vector_store %arg9[%c16_74, %c0_75], %136 {strides = array<i32>} : memref<144x256xbf16, #tpu.memory_space<vmem>>, vector<16x256xbf16>,
    %c0_76 = arith.constant 0 : index
    %c113_77 = arith.constant 113 : index
    %138 = vector.load %arg8[%c0_76, %c113_77] : memref<16x512xf32, #tpu.memory_space<vmem>>, vector<16x256xf32>
    %139 = arith.truncf %138 : vector<16x256xf32> to vector<16x256xbf16>
    %140 = vector.broadcast %36 : vector<1x256xbf16> to vector<16x256xbf16>
    %141 = arith.mulf %139, %140 : vector<16x256xbf16>
    %c32_78 = arith.constant 32 : index
    %c0_79 = arith.constant 0 : index
    %142 = vector.load %arg9[%c32_78, %c0_79] : memref<144x256xbf16, #tpu.memory_space<vmem>>, vector<16x256xbf16>
    tpu.vector_store %arg9[%c32_78, %c0_79], %141 {strides = array<i32>} : memref<144x256xbf16, #tpu.memory_space<vmem>>, vector<16x256xbf16>,
    %c0_80 = arith.constant 0 : index
    %c127_81 = arith.constant 127 : index
    %143 = vector.load %arg8[%c0_80, %c127_81] : memref<16x512xf32, #tpu.memory_space<vmem>>, vector<16x256xf32>
    %144 = arith.truncf %143 : vector<16x256xf32> to vector<16x256xbf16>
    %145 = vector.broadcast %28 : vector<1x256xbf16> to vector<16x256xbf16>
    %146 = arith.mulf %144, %145 : vector<16x256xbf16>
    %c48_82 = arith.constant 48 : index
    %c0_83 = arith.constant 0 : index
    %147 = vector.load %arg9[%c48_82, %c0_83] : memref<144x256xbf16, #tpu.memory_space<vmem>>, vector<16x256xbf16>
    tpu.vector_store %arg9[%c48_82, %c0_83], %146 {strides = array<i32>} : memref<144x256xbf16, #tpu.memory_space<vmem>>, vector<16x256xbf16>,
    %c0_84 = arith.constant 0 : index
    %c128_85 = arith.constant 128 : index
    %148 = vector.load %arg8[%c0_84, %c128_85] : memref<16x512xf32, #tpu.memory_space<vmem>>, vector<16x256xf32>
    %149 = arith.truncf %148 : vector<16x256xf32> to vector<16x256xbf16>
    %c64_86 = arith.constant 64 : index
    %c0_87 = arith.constant 0 : index
    %150 = vector.load %arg9[%c64_86, %c0_87] : memref<144x256xbf16, #tpu.memory_space<vmem>>, vector<16x256xbf16>
    tpu.vector_store %arg9[%c64_86, %c0_87], %149 {strides = array<i32>} : memref<144x256xbf16, #tpu.memory_space<vmem>>, vector<16x256xbf16>,
    %c0_88 = arith.constant 0 : index
    %c129_89 = arith.constant 129 : index
    %151 = vector.load %arg8[%c0_88, %c129_89] : memref<16x512xf32, #tpu.memory_space<vmem>>, vector<16x256xf32>
    %152 = arith.truncf %151 : vector<16x256xf32> to vector<16x256xbf16>
    %153 = vector.broadcast %36 : vector<1x256xbf16> to vector<16x256xbf16>
    %154 = arith.mulf %152, %153 : vector<16x256xbf16>
    %c80_90 = arith.constant 80 : index
    %c0_91 = arith.constant 0 : index
    %155 = vector.load %arg9[%c80_90, %c0_91] : memref<144x256xbf16, #tpu.memory_space<vmem>>, vector<16x256xbf16>
    tpu.vector_store %arg9[%c80_90, %c0_91], %154 {strides = array<i32>} : memref<144x256xbf16, #tpu.memory_space<vmem>>, vector<16x256xbf16>,
    %c0_92 = arith.constant 0 : index
    %c143_93 = arith.constant 143 : index
    %156 = vector.load %arg8[%c0_92, %c143_93] : memref<16x512xf32, #tpu.memory_space<vmem>>, vector<16x256xf32>
    %157 = arith.truncf %156 : vector<16x256xf32> to vector<16x256xbf16>
    %158 = vector.broadcast %28 : vector<1x256xbf16> to vector<16x256xbf16>
    %159 = arith.mulf %157, %158 : vector<16x256xbf16>
    %c96_94 = arith.constant 96 : index
    %c0_95 = arith.constant 0 : index
    %160 = vector.load %arg9[%c96_94, %c0_95] : memref<144x256xbf16, #tpu.memory_space<vmem>>, vector<16x256xbf16>
    tpu.vector_store %arg9[%c96_94, %c0_95], %159 {strides = array<i32>} : memref<144x256xbf16, #tpu.memory_space<vmem>>, vector<16x256xbf16>,
    %c0_96 = arith.constant 0 : index
    %c144_97 = arith.constant 144 : index
    %161 = vector.load %arg8[%c0_96, %c144_97] : memref<16x512xf32, #tpu.memory_space<vmem>>, vector<16x256xf32>
    %162 = arith.truncf %161 : vector<16x256xf32> to vector<16x256xbf16>
    %c112_98 = arith.constant 112 : index
    %c0_99 = arith.constant 0 : index
    %163 = vector.load %arg9[%c112_98, %c0_99] : memref<144x256xbf16, #tpu.memory_space<vmem>>, vector<16x256xbf16>
    tpu.vector_store %arg9[%c112_98, %c0_99], %162 {strides = array<i32>} : memref<144x256xbf16, #tpu.memory_space<vmem>>, vector<16x256xbf16>,
    %c0_100 = arith.constant 0 : index
    %c145_101 = arith.constant 145 : index
    %164 = vector.load %arg8[%c0_100, %c145_101] : memref<16x512xf32, #tpu.memory_space<vmem>>, vector<16x256xf32>
    %165 = arith.truncf %164 : vector<16x256xf32> to vector<16x256xbf16>
    %166 = vector.broadcast %36 : vector<1x256xbf16> to vector<16x256xbf16>
    %167 = arith.mulf %165, %166 : vector<16x256xbf16>
    %c128_102 = arith.constant 128 : index
    %c0_103 = arith.constant 0 : index
    %168 = vector.load %arg9[%c128_102, %c0_103] : memref<144x256xbf16, #tpu.memory_space<vmem>>, vector<16x256xbf16>
    tpu.vector_store %arg9[%c128_102, %c0_103], %167 {strides = array<i32>} : memref<144x256xbf16, #tpu.memory_space<vmem>>, vector<16x256xbf16>,
    %c0_104 = arith.constant 0 : index
    %c0_105 = arith.constant 0 : index
    %169 = vector.load %arg4[%c0_104, %c0_105] : memref<32x144xbf16, #tpu.memory_space<vmem>>, vector<32x144xbf16>
    %c0_106 = arith.constant 0 : index
    %c0_107 = arith.constant 0 : index
    %170 = vector.load %arg9[%c0_106, %c0_107] : memref<144x256xbf16, #tpu.memory_space<vmem>>, vector<144x256xbf16>
    %cst_108 = arith.constant dense<0.000000e+00> : vector<32x256xf32>
    %171 = tpu.matmul %169, %170, %cst_108 {dimension_numbers = #tpu.dot_dimension_numbers<[1], [0], [0], [1], [0, 0, 1, 1], [], []>} : vector<32x144xbf16>, vector<144x256xbf16>, vector<32x256xf32> -> vector<32x256xf32>
    %c0_109 = arith.constant 0 : index
    %c0_110 = arith.constant 0 : index
    %172 = vector.load %arg5[%c0_109, %c0_110] : memref<32x1xf32, #tpu.memory_space<vmem>>, vector<32x1xf32>
    %173 = vector.broadcast %172 : vector<32x1xf32> to vector<32x256xf32>
    %174 = arith.addf %171, %173 : vector<32x256xf32>
    %175 = vector.extract_strided_slice %174 {offsets = [0, 0], sizes = [8, 256], strides = [1, 1]} : vector<32x256xf32> to vector<8x256xf32>
    %176 = arith.negf %175 : vector<8x256xf32>
    %177 = math.exp %176 : vector<8x256xf32>
    %cst_111 = arith.constant 1.000000e+00 : f32
    %178 = vector.broadcast %cst_111 : f32 to vector<8x256xf32>
    %179 = arith.addf %178, %177 : vector<8x256xf32>
    %180 = arith.divf %178, %179 : vector<8x256xf32>
    %181 = vector.extract_strided_slice %174 {offsets = [8, 0], sizes = [8, 256], strides = [1, 1]} : vector<32x256xf32> to vector<8x256xf32>
    %182 = arith.negf %181 : vector<8x256xf32>
    %183 = math.exp %182 : vector<8x256xf32>
    %cst_112 = arith.constant 1.000000e+00 : f32
    %184 = vector.broadcast %cst_112 : f32 to vector<8x256xf32>
    %185 = arith.addf %184, %183 : vector<8x256xf32>
    %186 = arith.divf %184, %185 : vector<8x256xf32>
    %187 = vector.extract_strided_slice %174 {offsets = [16, 0], sizes = [8, 256], strides = [1, 1]} : vector<32x256xf32> to vector<8x256xf32>
    %188 = math.tanh %187 : vector<8x256xf32>
    %189 = vector.extract_strided_slice %174 {offsets = [24, 0], sizes = [8, 256], strides = [1, 1]} : vector<32x256xf32> to vector<8x256xf32>
    %190 = arith.negf %189 : vector<8x256xf32>
    %191 = math.exp %190 : vector<8x256xf32>
    %cst_113 = arith.constant 1.000000e+00 : f32
    %192 = vector.broadcast %cst_113 : f32 to vector<8x256xf32>
    %193 = arith.addf %192, %191 : vector<8x256xf32>
    %194 = arith.divf %192, %193 : vector<8x256xf32>
    %c1_114 = arith.constant 1 : index
    %c0_115 = arith.constant 0 : index
    %c0_116 = arith.constant 0 : index
    %195 = vector.load %arg3[%c1_114, %c0_115, %c0_116] : memref<2x8x256xf32, #tpu.memory_space<vmem>>, vector<1x8x256xf32>
    %196 = vector.shape_cast %195 : vector<1x8x256xf32> to vector<8x256xf32>
    %197 = arith.mulf %186, %196 : vector<8x256xf32>
    %198 = arith.mulf %180, %188 : vector<8x256xf32>
    %199 = arith.addf %197, %198 : vector<8x256xf32>
    %200 = math.tanh %199 : vector<8x256xf32>
    %201 = arith.mulf %194, %200 : vector<8x256xf32>
    %c1_117 = arith.constant 1 : index
    %c0_118 = arith.constant 0 : index
    %c0_119 = arith.constant 0 : index
    %202 = vector.load %arg1[%c1_117, %c0_118, %c0_119] : memref<2x8x256xf32, #tpu.memory_space<vmem>>, vector<1x8x256xf32>
    %203 = vector.shape_cast %202 : vector<1x8x256xf32> to vector<8x256xf32>
    %204 = arith.addf %201, %203 : vector<8x256xf32>
    %c1_120 = arith.constant 1 : index
    %c0_121 = arith.constant 0 : index
    %c0_122 = arith.constant 0 : index
    %205 = vector.load %arg6[%c1_120, %c0_121, %c0_122] : memref<2x8x256xf32, #tpu.memory_space<vmem>>, vector<1x8x256xf32>
    %206 = vector.shape_cast %205 : vector<1x8x256xf32> to vector<8x256xf32>
    %207 = vector.shape_cast %204 : vector<8x256xf32> to vector<1x8x256xf32>
    tpu.vector_store %arg6[%c1_120, %c0_121, %c0_122], %207 {strides = array<i32>} : memref<2x8x256xf32, #tpu.memory_space<vmem>>, vector<1x8x256xf32>,
    %c1_123 = arith.constant 1 : index
    %c0_124 = arith.constant 0 : index
    %c0_125 = arith.constant 0 : index
    %208 = vector.load %arg7[%c1_123, %c0_124, %c0_125] : memref<2x8x256xf32, #tpu.memory_space<vmem>>, vector<1x8x256xf32>
    %209 = vector.shape_cast %208 : vector<1x8x256xf32> to vector<8x256xf32>
    %210 = vector.shape_cast %199 : vector<8x256xf32> to vector<1x8x256xf32>
    tpu.vector_store %arg7[%c1_123, %c0_124, %c0_125], %210 {strides = array<i32>} : memref<2x8x256xf32, #tpu.memory_space<vmem>>, vector<1x8x256xf32>,
    return
  }
  func.func @transform_0(%arg0: i32) -> (i32, i32, i32) {
    %c0_i32 = arith.constant 0 : i32
    %c0_i32_0 = arith.constant 0 : i32
    %c0_i32_1 = arith.constant 0 : i32
    return %arg0, %c0_i32, %c0_i32_0 : i32, i32, i32
  }
  func.func @transform_1(%arg0: i32) -> (i32, i32, i32) {
    %c0_i32 = arith.constant 0 : i32
    %c0_i32_0 = arith.constant 0 : i32
    %c0_i32_1 = arith.constant 0 : i32
    return %arg0, %c0_i32, %c0_i32_0 : i32, i32, i32
  }
  func.func @transform_2(%arg0: i32) -> (i32, i32, i32) {
    %c0_i32 = arith.constant 0 : i32
    %c0_i32_0 = arith.constant 0 : i32
    %c0_i32_1 = arith.constant 0 : i32
    return %arg0, %c0_i32, %c0_i32_0 : i32, i32, i32
  }
  func.func @transform_3(%arg0: i32) -> (i32, i32) {
    %c0_i32 = arith.constant 0 : i32
    %c0_i32_0 = arith.constant 0 : i32
    %c0_i32_1 = arith.constant 0 : i32
    return %c0_i32, %c0_i32_0 : i32, i32
  }
  func.func @transform_4(%arg0: i32) -> (i32, i32) {
    %c0_i32 = arith.constant 0 : i32
    %c0_i32_0 = arith.constant 0 : i32
    %c0_i32_1 = arith.constant 0 : i32
    return %c0_i32, %c0_i32_0 : i32, i32
  }
  func.func @transform_5(%arg0: i32) -> (i32, i32, i32) {
    %c0_i32 = arith.constant 0 : i32
    %c0_i32_0 = arith.constant 0 : i32
    %c0_i32_1 = arith.constant 0 : i32
    return %arg0, %c0_i32, %c0_i32_0 : i32, i32, i32
  }
  func.func @transform_6(%arg0: i32) -> (i32, i32, i32) {
    %c0_i32 = arith.constant 0 : i32
    %c0_i32_0 = arith.constant 0 : i32
    %c0_i32_1 = arith.constant 0 : i32
    return %arg0, %c0_i32, %c0_i32_0 : i32, i32, i32
  }
}

</mosaic_0001>

<bundles_post_ra>
// kernel: tpu_custom_call.1
= control target key start
LH: loop header
LB: loop body
LE: loop exit
PB: predicated region body
PF: predicated region fallthrough
CT: control target
= control target key end

     0   :  { %s2514_s0 = inlined_call_operand.hbm [shape: f32[4,8,256], index: 0, kind: input, shape index: {}]   ;;  %s2515_s1 = inlined_call_operand.hbm [shape: f32[4,8,256], index: 1, kind: input, shape index: {}]   ;;  %s2516_s2 = inlined_call_operand.hbm [shape: f32[4,8,256], index: 2, kind: input, shape index: {}]   ;;  %s2517_s3 = inlined_call_operand.vmem [shape: bf16[32,144], index: 3, kind: input, shape index: {}]   ;;  %s2518_s4 = inlined_call_operand.vmem [shape: f32[32,1], index: 4, kind: input, shape index: {}]   ;;  %s2519_s5 = inlined_call_operand.hbm [shape: f32[4,8,256], index: 5, kind: output, shape index: {0}]   ;;  %s2520_s6 = inlined_call_operand.hbm [shape: f32[4,8,256], index: 6, kind: output, shape index: {1}]  }
   0x1   :  { %2530 = sst [smem:[#allocation19_spill]] %s2514_s0 }
   0x2   :  { %2531 = sst [smem:[#allocation20_spill]] %s2515_s1 }
   0x3   :  { %12 = vsyncpa [#allocation5], 0 }
   0x4   :  { %14 = vsyncpa [#allocation5 + $0x1], 0 }
   0x5   :  { %15 = vsyncpa [#allocation8], 0 }
   0x6   :  { %17 = vsyncpa [#allocation8 + $0x1], 0 }
   0x7   :  { %18 = vsyncpa [#allocation6], 0 }
   0x8   :  { %20 = vsyncpa [#allocation6 + $0x1], 0 }
   0x9   :  { %21 = vsyncpa [#allocation12], 0 }
   0xa   :  { %23 = vsyncpa [#allocation12 + $0x1], 0  ;;  %s1963_s21 = smov 0   ;;  %s1965_s22 = smov 0  }
   0xb   :  { %s1967_s23 = smov 0   ;;  %s1969_s24 = smov 0  }
   0xc LB: > { %s1984_s25 = sadd.s32 4294967295, %s1908_s24   ;;  %s1489_s26 = sadd.s32 4294967294, %s1908_s24   ;;  %s1908_s24 = sphi %s1969_s24, %s2551_s24   ;;  %s1904_s23 = sphi %s1967_s23, %s2555_s23   ;;  %s1900_s22 = sphi %s1965_s22, %s2554_s22   ;;  %s1896_s21 = sphi %s1963_s21, %s2553_s21  }
   0xd   : > { %s1988_s27 = sadd.s32 1, %s1908_s24   ;;  %s36_s28 = sadd.s32 1, %s1904_s23 }
   0xe   : > { %2532 = sst [smem:[#allocation17_spill]] %s1988_s27  ;;  %s33_s29 = ssub.s32 %s1908_s24, %s1988_s27 }
   0xf   : > { %p43_p0 = scmp.ne.s32.totalorder %s1904_s23, %s1900_s22  ;;  %p34_p1 = scmp.eq.s32.totalorder %s33_s29, 0 }
  0x10   : > { %p44_p2 = scmp.eq.s32.totalorder %s1908_s24, 0  ;;  %p49_p3 = scmp.ne.s32.totalorder %s1900_s22, %s1896_s21 }
  0x11   : > { %p50_p4 = scmp.eq.s32.totalorder %s1984_s25, 0  ;;  %p167_p7 = scmp.eq.s32.totalorder %s1984_s25, 1 }
  0x12   : > { %s2000_s30 = scalar_select %p34_p1, %s1904_s23, %s36_s28  }
  0x13   : > { %p45_p5 = por %p44_p2, %p43_p0  ;;  %p2002_p6 = por %p50_p4, %p49_p3 }
  0x14   : > { %2533 = sst [smem:[#allocation18_spill]] %s2000_s30  ;;  %p173_p8 = scmp.eq.s32.totalorder %s1489_s26, 1 }
  0x15   : > { %s2534_s7 = scalar_select %p2002_p6, 1, 0 }
  0x16   : > { %p1597_p10 = scmp.lt.s32.totalorder %s1908_s24, 2  ;;  %p2009_p11 = por %p167_p7, %p43_p0 }
  0x17   : > { %p2013_p12 = por %p173_p8, %p49_p3  ;;  %s2521_s10 = sand.u32 1, %s1904_s23  }
  0x18   : > { %s2535_s8 = scalar_select %p2009_p11, 1, 0 }
  0x19   : > { %s2536_s9 = scalar_select %p2013_p12, 1, 0 }
  0x1a   : > { %s2019_s11 = sshll.u32 %s1908_s24, 9  ;;  %s2023_s12 = sshll.u32 %s2521_s10, 5 }
  0x1b   : > { %p2025_p13 = pnand %p1597_p10, %p45_p5  ;;  %s247_s14 = sand.u32 1, %s1908_s24  }
  0x1c   : > { %s2538_s1 = sld [smem:[#allocation20_spill]]  ;;  %s251_s18 = scalar_lea.vmem [#allocation7], %s2023_s12 }
  0x1d   : > { %s259_s19 = sshll.u32 %s251_s18, 4  ;;  %s2040_s20 = scalar_lea.sflag [#allocation8], %s247_s14  ;;  %s2037_s19 = int_to_ptr.vmem [resolvable:$true] %s259_s19 }
  0x1e   : > { %p2046_p2 = pneg %p2025_p13 }
  0x22   : > { %s2034_s17 = scalar_lea.hbm %s2538_s1, %s2019_s11  ;;  %s1721_s16 = scalar_lea.hbm %s2538_s1, 1024 }
  0x23   : > { %s1716_s26 = scalar_lea.hbm %s2034_s17, 512  ;;  %p1722_p5 = scmp.lt.u32.totalorder %s2034_s17, %s2538_s1 }
  0x24   : > { %p1717_p1 = scmp.ne.s32.totalorder %s2034_s17, %s1716_s26  ;;  %p1723_p7 = scmp.lt.u32.totalorder %s1721_s16, %s1716_s26 }
  0x25   : > { %p1725_p10 = scmp.lt.u32.totalorder %s1716_s26, %s2034_s17 }
  0x26   : > { %p1719_p3 = pnand %p2046_p2, %p1717_p1  ;;  %p1724_p8 = por %p1723_p7, %p1722_p5 }
  0x28   : > { %p1720_p4 = pneg %p1719_p3  ;;  %p1726_p9 = por %p1725_p10, %p1724_p8 }
  0x2a   : > { %p1727_p0 = pnand %p1726_p9, %p1720_p4 }
  0x2c   : > { %1730 = shalt.err (!%p1727_p0)
}
  0x2d   : > { %s1731_s14 = scalar_lea.vmem %s2037_s19, 512  ;;  %s1910_s29 = smov [#allocation7]  }
  0x2e   : > { %p1732_p1 = scmp.ne.s32.totalorder %s2037_s19, %s1731_s14  ;;  %s1736_s15 = sshll.u32 %s1910_s29, 4  ;;  %s1737_s15 = int_to_ptr.vmem [resolvable:$false] %s1736_s15 }
  0x2f   : > { %s1738_s10 = scalar_lea.vmem %s1737_s15, 1024  ;;  %p1739_p11 = scmp.lt.s32.totalorder %s2037_s19, %s1737_s15 }
  0x30   : > { %p1734_p3 = pnand %p1732_p1, %p2046_p2  ;;  %p1740_p6 = scmp.lt.s32.totalorder %s1738_s10, %s1731_s14 }
  0x32   : > { %p1735_p12 = pneg %p1734_p3  ;;  %p1741_p5 = por %p1740_p6, %p1739_p11 }
  0x34   : > { %p1742_p7 = pnand %p1741_p5, %p1735_p12 }
  0x36   : > { %1745 = shalt.err (!%p1742_p7)
}
  0x37   : > { %s2524_s26 = smov 256   ;;  %s2526_s16 = smov 16  }
  0x38   : > { %1586 = dma.hbm_to_vmem [thread:$0]  (!%p2025_p13), %s2034_s17, 512, %s2037_s19, %s2040_s20, %s2524_s26, %s2524_s26, %s2526_s16  }
  0x39   : > { %p289_p6 = scmp.lt.s32.totalorder %s1908_s24, 3  ;;  %s2540_s0 = sld [smem:[#allocation19_spill]] }
  0x3a   : > { %p2541_p9 = scmp.ge.s32.totalorder %s1908_s24, 1  ;;  %s229_s10 = scalar_lea.vmem [#allocation4], %s2023_s12 }
  0x3b   : > { %s237_s1 = sshll.u32 %s229_s10, 4  ;;  %s2543_s17 = sand.u32 1, %s1904_s23   ;;  %s2087_s1 = int_to_ptr.vmem [resolvable:$true] %s237_s1 }
  0x3c   : > { %p2082_p11 = pnand %p2541_p9, %p289_p6  ;;  %s2091_s19 = scalar_lea.sflag [#allocation5], %s2543_s17 }
  0x3e   : > { %s2542_s15 = scalar_select %p2082_p11, 1, 0 }
  0x3f   : > { %s2078_s29 = scalar_lea.hbm %s2540_s0, %s2019_s11  ;;  %s1751_s16 = scalar_lea.hbm %s2540_s0, 1024 }
  0x40   : > { %s1746_s26 = scalar_lea.hbm %s2078_s29, 512  ;;  %p1752_p8 = scmp.lt.u32.totalorder %s2078_s29, %s2540_s0 }
  0x41   : > { %p1747_p12 = scmp.ne.s32.totalorder %s2078_s29, %s1746_s26  ;;  %p1753_p10 = scmp.lt.u32.totalorder %s1751_s16, %s1746_s26 }
  0x42   : > { %p1755_p3 = scmp.lt.u32.totalorder %s1746_s26, %s2078_s29 }
  0x43   : > { %p1749_p0 = pnand %p1747_p12, %p2046_p2  ;;  %p1754_p1 = por %p1753_p10, %p1752_p8 }
  0x45   : > { %p1750_p4 = pneg %p1749_p0  ;;  %p1756_p5 = por %p1755_p3, %p1754_p1 }
  0x47   : > { %p1757_p7 = pnand %p1756_p5, %p1750_p4 }
  0x49   : > { %1760 = shalt.err (!%p1757_p7)
}
  0x4a   : > { %s1761_s10 = scalar_lea.vmem %s2087_s1, 512  ;;  %s1913_s17 = smov [#allocation4]  }
  0x4b   : > { %p1762_p6 = scmp.ne.s32.totalorder %s2087_s1, %s1761_s10  ;;  %s1766_s18 = sshll.u32 %s1913_s17, 4  ;;  %s1767_s18 = int_to_ptr.vmem [resolvable:$false] %s1766_s18 }
  0x4c   : > { %s1768_s27 = scalar_lea.vmem %s1767_s18, 1024  ;;  %p1769_p0 = scmp.lt.s32.totalorder %s2087_s1, %s1767_s18 }
  0x4d   : > { %p1764_p9 = pnand %p1762_p6, %p2046_p2  ;;  %p1770_p11 = scmp.lt.s32.totalorder %s1768_s27, %s1761_s10 }
  0x4f   : > { %p1765_p12 = pneg %p1764_p9  ;;  %p1771_p8 = por %p1770_p11, %p1769_p0 }
  0x51   : > { %p1772_p10 = pnand %p1771_p8, %p1765_p12 }
  0x53   : > { %1775 = shalt.err (!%p1772_p10)
}
  0x54   : > { %s2544_s30 = smov 16   ;;  %s2545_s26 = smov 256  }
  0x55   : > { %1583 = dma.hbm_to_vmem [thread:$0]  (!%p2025_p13), %s2078_s29, 512, %s2087_s1, %s2091_s19, %s2545_s26, %s2545_s26, %s2544_s30  }
  0x56   : > { %s2122_s17 = scalar_lea.hbm %s2516_s2, %s2019_s11  ;;  %s273_s10 = scalar_lea.vmem [#allocation9], %s2023_s12 }
  0x57   : > { %s281_s18 = sshll.u32 %s273_s10, 4  ;;  %s1776_s27 = scalar_lea.hbm %s2122_s17, 512  ;;  %s2125_s18 = int_to_ptr.vmem [resolvable:$true] %s281_s18 }
  0x58   : > { %p1777_p11 = scmp.ne.s32.totalorder %s2122_s17, %s1776_s27  ;;  %s1781_s29 = scalar_lea.hbm %s2516_s2, 1024 }
  0x59   : > { %p1782_p3 = scmp.lt.u32.totalorder %s2122_s17, %s2516_s2  ;;  %p1783_p5 = scmp.lt.u32.totalorder %s1781_s29, %s1776_s27 }
  0x5a   : > { %p1779_p4 = pnand %p1777_p11, %p2046_p2  ;;  %p1785_p6 = scmp.lt.u32.totalorder %s1776_s27, %s2122_s17 }
  0x5b   : > { %p1784_p7 = por %p1783_p5, %p1782_p3 }
  0x5c   : > { %p1780_p1 = pneg %p1779_p4 }
  0x5d   : > { %p1786_p9 = por %p1785_p6, %p1784_p7 }
  0x5f   : > { %p1787_p12 = pnand %p1786_p9, %p1780_p1 }
  0x61   : > { %1790 = shalt.err (!%p1787_p12)
}
  0x62   : > { %s1791_s12 = scalar_lea.vmem %s2125_s18, 512  ;;  %s1914_s0 = smov [#allocation9]  }
  0x63   : > { %p1792_p0 = scmp.ne.s32.totalorder %s2125_s18, %s1791_s12  ;;  %s1796_s16 = sshll.u32 %s1914_s0, 4  ;;  %s1797_s16 = int_to_ptr.vmem [resolvable:$false] %s1796_s16 }
  0x64   : > { %s1798_s14 = scalar_lea.vmem %s1797_s16, 1024  ;;  %p1799_p11 = scmp.lt.s32.totalorder %s2125_s18, %s1797_s16 }
  0x65   : > { %p1794_p8 = pnand %p1792_p0, %p2046_p2  ;;  %p1800_p4 = scmp.lt.s32.totalorder %s1798_s14, %s1791_s12 }
  0x67   : > { %p1795_p10 = pneg %p1794_p8  ;;  %p1801_p3 = por %p1800_p4, %p1799_p11 }
  0x69   : > { %p1802_p5 = pnand %p1801_p3, %p1795_p10 }
  0x6b   : > { %1805 = shalt.err (!%p1802_p5)
}
  0x6c   : > { %1589 = dma.hbm_to_vmem [thread:$0]  (!%p2025_p13), %s2122_s17, 512, %s2125_s18, %s2040_s20, %s2545_s26, %s2545_s26, %s2544_s30  }
  0x6d   : > { %p2546_p2 = scmp.ne.s32.totalorder %s2542_s15, 0 }
  0x6e   : > { %s2155_s28 = sand.u32 (!%p2546_p2), 1, %s1900_s22   ;;  %p2547_p1 = scmp.ne.s32.totalorder (!%p2546_p2), %s2534_s7, 0 }
  0x6f   : > { %293 = sbr.rel (%p2546_p2) target bundleno = 729 (0x2d9), region = 40  ;;  %s2158_s10 = sshll.u32 (!%p2546_p2), %s2155_s28, 5 }
  0x70   : > { %s296_s13 = scalar_lea.sflag (!%p2546_p2), [#allocation5], %s2155_s28  ;;  %s2162_s27 = scalar_lea.vmem (!%p2546_p2), [#allocation4], %s2158_s10 }
  0x76   : > { %1879 = dma.done.wait (%p2547_p1), %s296_s13, 512  }
  0x77   : > { %1881 = vsyncadd (%p2547_p1), %s296_s13, 4294966784  ;;  %s304_s20 = sand.u32 1, %s1984_s25   ;;  %s2170_s30 = scalar_lea.vmem [#allocation7], %s2158_s10  ;;  %v373_v0 = vlaneseq }
  0x78   : > { %s305_s15 = scalar_lea.sflag [#allocation8], %s304_s20 }
  0x79   : > { %1883 = dma.done.wait (%p2547_p1), %s305_s15, 1024  }
  0x7a   : > { %1885 = vsyncadd (%p2547_p1), %s305_s15, 4294966272  ;;  %vm367_vm0 = vcmask 1048440   ;;  %vm370_vm1 = vcmask 138240   ;;  %v1915_v1 = vmov 0.0   ;;  %v374_v2 = vand.u32 127, %v373_v0  ;;  %v2179_v10 = vld [vmem:[%s2162_s27 + $0x10] sm:$0xff] }
  0x7b   : > { %368 = vst.msk [vmem:[#allocation2] sm:$0xff] %vm367_vm0, %v1915_v1  ;;  %369 = vst.msk [vmem:[#allocation2 + $0x20] sm:$0xff] %vm367_vm0, %v1915_v1  ;;  %v1528_v11 = vld [vmem:[%s2170_s30 + $0x10] sm:$0xff]  ;;  %v1527_v13 = vld [vmem:[%s2162_s27 + $0x18] sm:$0xff]  ;;  %s1916_s7 = smov 113   ;;  %s1917_s26 = smov 111  }
  0x7c   : > { %371 = vst.msk [vmem:[#allocation2 + $0x18] sm:$0xff] %vm370_vm1, %v1915_v1  ;;  %372 = vst.msk [vmem:[#allocation2 + $0x38] sm:$0xff] %vm370_vm1, %v1915_v1  ;;  %v380_v3 = vand.u32 15, %v374_v2  ;;  %v375_v4 = vadd.s32 128, %v374_v2  ;;  %v1529_v14 = vld [vmem:[%s2170_s30 + $0x18] sm:$0xff]  ;;  %s1918_s17 = smov 127   ;;  %v2209_v24 = vpack.c.bf16 %v1528_v11, %v2179_v10 }
  0x7d   : > { %s1919_s18 = smov 1   ;;  %s1920_s1 = smov 15   ;;  %v424_v18 = vld [vmem:[%s2162_s27] sm:$0xff]  ;;  %v425_v20 = vld [vmem:[%s2162_s27 + $0x8] sm:$0xff]  ;;  %v2211_v25 = vpack.c.bf16 %v1529_v14, %v1527_v13  ;;  %vm447_vm6 = vcmask 908288   ;;  %vm511_vm7 = vcmask 924672  }
  0x7e   : > { %vm414_vm2 = vcmp.lt.s32.totalorder %v380_v3, 15  ;;  %vm400_vm3 = vcmp.ge.s32.totalorder %v380_v3, 1  ;;  %v387_v5 = vand.u32 15, %v375_v4  ;;  %v428_v19 = vld [vmem:[%s2170_s30] sm:$0xff]  ;;  %v429_v21 = vld [vmem:[%s2170_s30 + $0x8] sm:$0xff]  ;;  %s1921_s29 = smov 17  }
  0x7f   : > { %v1512_v6 = vsel %vm414_vm2, 1.0, %v1915_v1  ;;  %v1510_v7 = vsel %vm400_vm3, 1.0, %v1915_v1  ;;  %v2200_v22 = vpack.c.bf16 %v428_v19, %v424_v18  ;;  %v2202_v23 = vpack.c.bf16 %v429_v21, %v425_v20  ;;  %s1922_s19 = smov 16   ;;  %s1923_s11 = smov 112  }
  0x80   : > { %v422_v8 = vpack.c.bf16 %v1512_v6, %v1512_v6  ;;  %v410_v9 = vpack.c.bf16 %v1510_v7, %v1510_v7  ;;  %vm415_vm4 = vcmp.lt.s32.totalorder %v387_v5, 15  ;;  %vm401_vm5 = vcmp.ge.s32.totalorder %v387_v5, 1  ;;  %s317_s0 = scalar_lea.vmem [#allocation9], %s2158_s10  ;;  %s1567_s16 = sshll.u32 %s1984_s25, 9 }
  0x81   : > { %v1513_v12 = vsel %vm415_vm4, 1.0, %v1915_v1  ;;  %v1511_v16 = vsel %vm401_vm5, 1.0, %v1915_v1  ;;  %vm548_vm8 = vcmask 1039360   ;;  %vm668_vm9 = vcmask 916480   ;;  %s360_s14 = scalar_lea.vmem [#allocation11], %s2158_s10  ;;  %s2424_s30 = scalar_lea.hbm %s2520_s6, %s1567_s16 }
  0x82   : > { %507 = vrot.lane.b32.xlu1 %v422_v8, %s1916_s7  ;;  %443 = vrot.lane.b32.xlu0 %v410_v9, %s1917_s26  ;;  %v423_v15 = vpack.c.bf16 %v1513_v12, %v1513_v12  ;;  %v411_v17 = vpack.c.bf16 %v1511_v16, %v1511_v16  ;;  %v471_v26 = vld [vmem:[#allocation2] sm:$0xff]  ;;  %vm565_vm10 = vcmask 7168   ;;  %vm528_vm11 = vcmask 121856   ;;  %s1341_s13 = sshll.u32 %s360_s14, 4  ;;  %p2548_p7 = scmp.ne.s32.totalorder %s2535_s8, 0  ;;  %s2426_s13 = int_to_ptr.vmem [resolvable:$true] %s1341_s13 }
  0x83   : > { %v474_v27 = vld [vmem:[#allocation2 + $0x20] sm:$0xff]  ;;  %v652_v29 = vld [vmem:[#allocation2 + $0x18] sm:$0xff]  ;;  %vm489_vm12 = vcmask 130048  }
  0x84   : > { %v477_v28 = vpack.c.bf16 %v474_v27, %v471_v26  ;;  %v655_v30 = vld [vmem:[#allocation2 + $0x38] sm:$0xff] }
  0x85   : > { %v2219_v31 = vpack.c.bf16 %v655_v30, %v652_v29 }
  0x86   : > { %509 = vrot.lane.b32.xlu1 %v423_v15, %s1916_s7  ;;  %544 = vrot.lane.b32.xlu0 %v410_v9, %s1918_s17 }
  0x8a   : > { %546 = vrot.lane.b32.xlu1 %v411_v17, %s1918_s17  ;;  %589 = vrot.lane.b32.xlu0 %v422_v8, %s1919_s18 }
  0x8e   : > { %591 = vrot.lane.b32.xlu1 %v423_v15, %s1919_s18  ;;  %445 = vrot.lane.b32.xlu0 %v411_v17, %s1917_s26 }
  0x92   : > { %626 = vrot.lane.b32.xlu1 %v411_v17, %s1920_s1  ;;  %624 = vrot.lane.b32.xlu0 %v410_v9, %s1920_s1 }
  0x96   : > { %686 = vrot.lane.b32.xlu1 %v423_v15, %s1921_s29  ;;  %684 = vrot.lane.b32.xlu0 %v422_v8, %s1921_s29 }
  0x9a   : > { %485 = vrot.lane.b32.xlu0 %v2200_v22, %s1922_s19  ;;  %487 = vrot.lane.b32.xlu1 %v2202_v23, %s1922_s19 }
  0x9e   : > { %943 = vrot.lane.b32.xlu0 %v2209_v24, %s1922_s19  ;;  %945 = vrot.lane.b32.xlu1 %v2211_v25, %s1922_s19 }
  0xa2   : > { %483 = vrot.lane.b32.xlu0 %v477_v28, %s1922_s19  ;;  %941 = vrot.lane.b32.xlu1 %v477_v28, %s1922_s19 }
  0xa6   : > { %664 = vrot.lane.b32.xlu0 %v2202_v23, %s1923_s11  ;;  %666 = vrot.lane.b32.xlu1 %v2219_v31, %s1923_s11 }
  0xaa   : > { %1083 = vrot.lane.b32.xlu0 %v2211_v25, %s1923_s11  ;;  %1085 = vrot.lane.b32.xlu1 %v2219_v31, %s1923_s11 }
  0xae   : > { %662 = vrot.lane.b32.xlu0 %v2200_v22, %s1923_s11  ;;  %1081 = vrot.lane.b32.xlu1 %v2209_v24, %s1923_s11 }
  0xf4   : > { %v508_v32 = vpop.permute.xlu1 %507  ;;  %v444_v33 = vpop.permute.xlu0 %443 }
  0xf5   : > { %v452_v34 = vmul.bf16 %v477_v28, %v444_v33  ;;  %v516_v35 = vmul.bf16 %v508_v32, %v477_v28 }
  0xf7   : > { %917 = vrot.lane.b32.xlu1 %v452_v34, %s1921_s29  ;;  %458 = vrot.lane.b32.xlu0 %v452_v34, %s1921_s29 }
  0xf8   : > { %v510_v36 = vpop.permute.xlu1 %509  ;;  %v545_v37 = vpop.permute.xlu0 %544 }
  0xf9   : > { %v553_v40 = vmul.bf16 %v545_v37, %v477_v28  ;;  %v512_v57 = vsel %vm511_vm7, %v508_v32, %v510_v36  ;;  %v518_v59 = vmul.bf16 %v510_v36, %v2202_v23  ;;  %v964_v2 = vmul.bf16 %v2211_v25, %v510_v36 }
  0xfa   : > { %v517_v62 = vmul.bf16 %v512_v57, %v2200_v22  ;;  %v963_v1 = vmul.bf16 %v2209_v24, %v512_v57  ;;  %v1924_v36 = vmov 0  }
  0xfb   : > { %968 = vrot.lane.b32.xlu1 %v516_v35, %s1920_s1  ;;  %522 = vrot.lane.b32.xlu0 %v516_v35, %s1920_s1 }
  0xfc   : > { %v2231_v38 = vpop.permute.xlu1 %546  ;;  %v590_v39 = vpop.permute.xlu0 %589  ;;  %1644 = vset.pattern.permute.xlu0 %v1924_v36  ;;  %1645 = vset.pattern.permute.xlu1 %v1924_v36 }
  0xfd   : > { %v597_v43 = vmul.bf16 %v590_v39, %v2200_v22  ;;  %v1024_v44 = vmul.bf16 %v2209_v24, %v590_v39  ;;  %v549_v3 = vsel %vm548_vm8, %v545_v37, %v2231_v38  ;;  %v555_v4 = vmul.bf16 %v2231_v38, %v2202_v23  ;;  %v732_v37 = vld [vmem:[%s2518_s4] sm:$0xff] }
  0xfe   : > { %v554_v7 = vmul.bf16 %v549_v3, %v2200_v22  ;;  %v990_v12 = vmul.bf16 %v2209_v24, %v549_v3  ;;  %v991_v14 = vmul.bf16 %v2211_v25, %v2231_v38  ;;  %v733_v38 = vld [vmem:[%s2518_s4 + $0x8] sm:$0xff] }
  0xff   : > { %995 = vrot.lane.b32.xlu1 %v553_v40, %s1919_s18  ;;  %559 = vrot.lane.b32.xlu0 %v553_v40, %s1919_s18  ;;  %v734_v40 = vld [vmem:[%s2518_s4 + $0x10] sm:$0xff] }
 0x100   : > { %v592_v41 = vpop.permute.xlu1 %591  ;;  %v446_v42 = vpop.permute.xlu0 %445 }
 0x101   : > { %v448_v48 = vsel %vm447_vm6, %v444_v33, %v446_v42  ;;  %v454_v53 = vmul.bf16 %v2202_v23, %v446_v42  ;;  %v913_v58 = vmul.bf16 %v2211_v25, %v446_v42  ;;  %v593_v15 = vsel %vm565_vm10, %v590_v39, %v592_v41  ;;  %v1648_v33 = vld [vmem:[%s2517_s3 + $0x4] ss:$8 sps:$4 sm:$0xff]   ;;  %v735_v39 = vld [vmem:[%s2518_s4 + $0x18] sm:$0xff] }
 0x102   : > { %v453_v52 = vmul.bf16 %v2200_v22, %v448_v48  ;;  %v912_v56 = vmul.bf16 %v2209_v24, %v448_v48  ;;  %v599_v16 = vmul.bf16 %v2219_v31, %v592_v41  ;;  %v598_v18 = vmul.bf16 %v593_v15, %v2202_v23  ;;  %1518 = vmatprep.mubr.msk.bf16.mxu0 %vm489_vm12, %v1648_v33 }
 0x103   : > { %1030 = vrot.lane.b32.xlu1 %v1024_v44, %s1918_s17  ;;  %603 = vrot.lane.b32.xlu0 %v597_v43, %s1918_s17  ;;  %v1025_v20 = vmul.bf16 %v2211_v25, %v593_v15 }
 0x104   : > { %v627_v45 = vpop.permute.xlu1 %626  ;;  %v625_v46 = vpop.permute.xlu0 %624  ;;  %1534 = vmatprep.mubr.msk.bf16.mxu1 %vm489_vm12, %v1648_v33 }
 0x105   : > { %v632_v47 = vmul.bf16 %v625_v46, %v2200_v22  ;;  %v1051_v49 = vmul.bf16 %v2209_v24, %v625_v46  ;;  %v628_v21 = vsel %vm528_vm11, %v625_v46, %v627_v45  ;;  %v634_v26 = vmul.bf16 %v2219_v31, %v627_v45 }
 0x106   : > { %v633_v27 = vmul.bf16 %v628_v21, %v2202_v23  ;;  %v1052_v29 = vmul.bf16 %v2211_v25, %v628_v21 }
 0x107   : > { %638 = vrot.lane.b32.xlu0 %v632_v47, %s1916_s7  ;;  %1057 = vrot.lane.b32.xlu1 %v1051_v49, %s1916_s7 }
 0x108   : > { %v2244_v50 = vpop.permute.xlu1 %686  ;;  %v2246_v51 = vpop.permute.xlu0 %684 }
 0x109   : > { %v688_v28 = vsel %vm370_vm1, %v2246_v51, %v2244_v50  ;;  %v694_v32 = vmul.bf16 %v2244_v50, %v2219_v31  ;;  %v692_v31 = vmul.bf16 %v2246_v51, %v2200_v22  ;;  %v1102_v35 = vmul.bf16 %v2209_v24, %v2246_v51 }
 0x10a   : > { %v693_v30 = vmul.bf16 %v688_v28, %v2202_v23  ;;  %v1103_v34 = vmul.bf16 %v2211_v25, %v688_v28 }
 0x10b   : > { %460 = vrot.lane.b32.xlu0 %v453_v52, %s1921_s29  ;;  %462 = vrot.lane.b32.xlu1 %v454_v53, %s1921_s29 }
 0x10c   : > { %v2252_v54 = vpop.permute.xlu0 %485  ;;  %v2254_v55 = vpop.permute.xlu1 %487 }
 0x10f   : > { %919 = vrot.lane.b32.xlu0 %v912_v56, %s1921_s29  ;;  %921 = vrot.lane.b32.xlu1 %v913_v58, %s1921_s29  ;;  %v491_v58 = vsel %vm489_vm12, %v2252_v54, %v2254_v55 }
 0x110   : > { %v2262_v60 = vpop.permute.xlu0 %943  ;;  %v2264_v61 = vpop.permute.xlu1 %945 }
 0x113   : > { %524 = vrot.lane.b32.xlu0 %v517_v62, %s1920_s1  ;;  %526 = vrot.lane.b32.xlu1 %v518_v59, %s1920_s1 }
 0x114   : > { %v2269_v63 = vpop.permute.xlu0 %483  ;;  %v2271_v0 = vpop.permute.xlu1 %941 }
 0x115   : > { %v490_v3 = vsel %vm489_vm12, %v2269_v63, %v2252_v54 }
 0x117   : > { %970 = vrot.lane.b32.xlu0 %v963_v1, %s1920_s1  ;;  %972 = vrot.lane.b32.xlu1 %v964_v2, %s1920_s1 }
 0x118   : > { %v2281_v5 = vpop.permute.xlu0 %664  ;;  %v667_v6 = vpop.permute.xlu1 %666 }
 0x119   : > { %v2286_v8 = vsel %vm668_vm9, %v2281_v5, %v667_v6 }
 0x11b   : > { %561 = vrot.lane.b32.xlu0 %v554_v7, %s1919_s18  ;;  %563 = vrot.lane.b32.xlu1 %v555_v4, %s1919_s18  ;;  %v948_v4 = vsel %vm489_vm12, %v2262_v60, %v2264_v61 }
 0x11c   : > { %v1084_v9 = vpop.permute.xlu0 %1083  ;;  %v1086_v11 = vpop.permute.xlu1 %1085 }
 0x11d   : > { %v2292_v13 = vsel %vm668_vm9, %v1084_v9, %v1086_v11  ;;  %v947_v11 = vsel %vm489_vm12, %v2271_v0, %v2262_v60 }
 0x11f   : > { %997 = vrot.lane.b32.xlu0 %v990_v12, %s1919_s18  ;;  %999 = vrot.lane.b32.xlu1 %v991_v14, %s1919_s18 }
 0x120   : > { %v1082_v17 = vpop.permute.xlu1 %1081  ;;  %v2351_v41 = vpop.permute.xlu0 %662 }
 0x121   : > { %v2302_v19 = vsel %vm668_vm9, %v1082_v17, %v1084_v9 }
 0x123   : > { %605 = vrot.lane.b32.xlu0 %v598_v18, %s1918_s17  ;;  %607 = vrot.lane.b32.xlu1 %v599_v16, %s1918_s17 }
 0x127   : > { %1032 = vrot.lane.b32.xlu0 %v1025_v20, %s1918_s17  ;;  %1034 = vrot.lane.b32.xlu1 %v599_v16, %s1918_s17  ;;  %s1925_s17 = smov [#allocation11]  }
 0x128   : > { %s1810_s18 = sshll.u32 %s1925_s17, 4  ;;  %s1811_s18 = int_to_ptr.vmem [resolvable:$false] %s1810_s18 }
 0x129   : > { %s1812_s1 = scalar_lea.vmem %s1811_s18, 1024  ;;  %p1813_p12 = scmp.lt.s32.totalorder %s2426_s13, %s1811_s18 }
 0x12b   : > { %640 = vrot.lane.b32.xlu0 %v633_v27, %s1916_s7  ;;  %642 = vrot.lane.b32.xlu1 %v634_v26, %s1916_s7 }
 0x12f   : > { %1059 = vrot.lane.b32.xlu0 %v1052_v29, %s1916_s7  ;;  %1061 = vrot.lane.b32.xlu1 %v634_v26, %s1916_s7  ;;  %s1310_s7 = scalar_lea.sflag [#allocation12], %s2155_s28 }
 0x133   : > { %700 = vrot.lane.b32.xlu0 %v693_v30, %s1917_s26  ;;  %702 = vrot.lane.b32.xlu1 %v694_v32, %s1917_s26 }
 0x137   : > { %1110 = vrot.lane.b32.xlu0 %v1103_v34, %s1917_s26  ;;  %1112 = vrot.lane.b32.xlu1 %v694_v32, %s1917_s26 }
 0x13b   : > { %698 = vrot.lane.b32.xlu0 %v692_v31, %s1917_s26  ;;  %1108 = vrot.lane.b32.xlu1 %v1102_v35, %s1917_s26  ;;  %s1806_s26 = scalar_lea.vmem %s2426_s13, 512 }
 0x13c   : > { %p1807_p13 = scmp.ne.s32.totalorder %s2426_s13, %s1806_s26  ;;  %p1814_p0 = scmp.lt.s32.totalorder %s1812_s1, %s1806_s26 }
 0x13e   : > { %p1808_p6 = pnand %p1807_p13, %p2548_p7  ;;  %p1815_p8 = por %p1814_p0, %p1813_p12 }
 0x13f   : > { %738 = vperm.xlu0 %1644, %v732_v37   ;;  %743 = vperm.xlu1 %1645, %v733_v38  }
 0x140   : > { %p1809_p9 = pneg %p1808_p6 }
 0x142   : > { %p1816_p10 = pnand %p1815_p8, %p1809_p9 }
 0x143   : > { %1153 = vperm.xlu0 %1644, %v733_v38   ;;  %1148 = vperm.xlu1 %1645, %v732_v37   ;;  %v669_v37 = vsel %vm668_vm9, %v2351_v41, %v2281_v5  ;;  %v1646_v41 = vld [vmem:[%s2517_s3] ss:$8 sps:$4 sm:$0xff]  }
 0x147   : > { %753 = vperm.xlu0 %1644, %v735_v39   ;;  %748 = vperm.xlu1 %1645, %v734_v40  }
 0x14b   : > { %1163 = vperm.xlu0 %1644, %v735_v39   ;;  %1158 = vperm.xlu1 %1645, %v734_v40  }
 0x169   : > { %v918_v42 = vpop.permute.xlu1 %917  ;;  %v459_v43 = vpop.permute.xlu0 %458 }
 0x16d   : > { %v969_v44 = vpop.permute.xlu1 %968  ;;  %v523_v45 = vpop.permute.xlu0 %522 }
 0x171   : > { %v996_v46 = vpop.permute.xlu1 %995  ;;  %v560_v47 = vpop.permute.xlu0 %559 }
 0x175   : > { %v1031_v48 = vpop.permute.xlu1 %1030  ;;  %v604_v49 = vpop.permute.xlu0 %603 }
 0x179   : > { %v2353_v50 = vpop.permute.xlu0 %638  ;;  %v2355_v51 = vpop.permute.xlu1 %1057 }
 0x17d   : > { %v461_v52 = vpop.permute.xlu0 %460  ;;  %v463_v53 = vpop.permute.xlu1 %462 }
 0x17e   : > { %v465_v56 = vsel %vm370_vm1, %v459_v43, %v461_v52  ;;  %v466_v57 = vsel %vm370_vm1, %v461_v52, %v463_v53 }
 0x17f   : > { %781 = vmatprep.subr.bf16.mxu0 %v466_v57 }
 0x180   : > { %782 = vmatpush1.bf16.msra.mxu0 %v465_v56 }
 0x181   : > { %v920_v59 = vpop.permute.xlu0 %919  ;;  %v922_v62 = vpop.permute.xlu1 %921  ;;  %783 = vmatprep.subr.bf16.mxu0 %v491_v58 }
 0x182   : > { %v923_v1 = vsel %vm370_vm1, %v918_v42, %v920_v59  ;;  %v924_v2 = vsel %vm370_vm1, %v920_v59, %v922_v62 }
 0x183   : > { %1190 = vmatprep.subr.bf16.mxu1 %v924_v2 }
 0x184   : > { %784 = vmatpush1.bf16.msra.mxu0 %v490_v3  ;;  %1191 = vmatpush1.bf16.msra.mxu1 %v923_v1 }
 0x185   : > { %v525_v6 = vpop.permute.xlu0 %524  ;;  %v527_v55 = vpop.permute.xlu1 %526  ;;  %1192 = vmatprep.subr.bf16.mxu1 %v948_v4 }
 0x186   : > { %v529_v7 = vsel %vm528_vm11, %v523_v45, %v525_v6  ;;  %v530_v9 = vsel %vm528_vm11, %v525_v6, %v527_v55 }
 0x187   : > { %785 = vmatprep.subr.bf16.mxu0 %v530_v9 }
 0x188   : > { %786 = vmatpush1.bf16.msra.mxu0 %v529_v7  ;;  %1193 = vmatpush1.bf16.msra.mxu1 %v947_v11 }
 0x189   : > { %v971_v54 = vpop.permute.xlu0 %970  ;;  %v973_v63 = vpop.permute.xlu1 %972 }
 0x18a   : > { %v974_v12 = vsel %vm528_vm11, %v969_v44, %v971_v54  ;;  %v975_v61 = vsel %vm528_vm11, %v971_v54, %v973_v63 }
 0x18b   : > { %1194 = vmatprep.subr.bf16.mxu1 %v975_v61 }
 0x18c   : > { %1195 = vmatpush1.bf16.msra.mxu1 %v974_v12 }
 0x18d   : > { %v562_v14 = vpop.permute.xlu0 %561  ;;  %v564_v15 = vpop.permute.xlu1 %563 }
 0x18e   : > { %v566_v16 = vsel %vm565_vm10, %v560_v47, %v562_v14  ;;  %v567_v17 = vsel %vm565_vm10, %v562_v14, %v564_v15 }
 0x18f   : > { %787 = vmatprep.subr.bf16.mxu0 %v567_v17 }
 0x190   : > { %788 = vmatpush1.bf16.msra.mxu0 %v566_v16 }
 0x191   : > { %v998_v18 = vpop.permute.xlu0 %997  ;;  %v1000_v60 = vpop.permute.xlu1 %999  ;;  %789 = vmatprep.subr.bf16.mxu0 %v2202_v23 }
 0x192   : > { %v1001_v0 = vsel %vm565_vm10, %v996_v46, %v998_v18  ;;  %v1002_v20 = vsel %vm565_vm10, %v998_v18, %v1000_v60  ;;  %v1651_v46 = vld [vmem:[%s2517_s3 + $0x10] ss:$8 sps:$4 sm:$0xff]  }
 0x193   : > { %1196 = vmatprep.subr.bf16.mxu1 %v1002_v20 }
 0x194   : > { %790 = vmatpush1.bf16.msra.mxu0 %v2200_v22  ;;  %1197 = vmatpush1.bf16.msra.mxu1 %v1001_v0 }
 0x195   : > { %v606_v21 = vpop.permute.xlu0 %605  ;;  %v608_v26 = vpop.permute.xlu1 %607  ;;  %1198 = vmatprep.subr.bf16.mxu1 %v2211_v25 }
 0x196   : > { %v609_v27 = vsel %vm548_vm8, %v604_v49, %v606_v21  ;;  %v610_v28 = vsel %vm548_vm8, %v606_v21, %v608_v26 }
 0x197   : > { %791 = vmatprep.subr.bf16.mxu0 %v610_v28 }
 0x198   : > { %792 = vmatpush1.bf16.msra.mxu0 %v609_v27  ;;  %1199 = vmatpush1.bf16.msra.mxu1 %v2209_v24 }
 0x199   : > { %v1033_v23 = vpop.permute.xlu0 %1032  ;;  %v1035_v29 = vpop.permute.xlu1 %1034 }
 0x19a   : > { %v1036_v30 = vsel %vm548_vm8, %v1031_v48, %v1033_v23  ;;  %v1037_v32 = vsel %vm548_vm8, %v1033_v23, %v1035_v29 }
 0x19b   : > { %1200 = vmatprep.subr.bf16.mxu1 %v1037_v32 }
 0x19c   : > { %1201 = vmatpush1.bf16.msra.mxu1 %v1036_v30 }
 0x19d   : > { %v641_v22 = vpop.permute.xlu0 %640  ;;  %v643_v33 = vpop.permute.xlu1 %642 }
 0x19e   : > { %v644_v25 = vsel %vm511_vm7, %v2353_v50, %v641_v22  ;;  %v645_v34 = vsel %vm511_vm7, %v641_v22, %v643_v33 }
 0x19f   : > { %793 = vmatprep.subr.bf16.mxu0 %v645_v34 }
 0x1a0   : > { %794 = vmatpush1.bf16.msra.mxu0 %v644_v25 }
 0x1a1   : > { %v1060_v31 = vpop.permute.xlu0 %1059  ;;  %v1062_v35 = vpop.permute.xlu1 %1061  ;;  %795 = vmatprep.subr.bf16.mxu0 %v2286_v8 }
 0x1a2   : > { %v1063_v24 = vsel %vm511_vm7, %v2355_v51, %v1060_v31  ;;  %v1064_v36 = vsel %vm511_vm7, %v1060_v31, %v1062_v35 }
 0x1a3   : > { %1202 = vmatprep.subr.bf16.mxu1 %v1064_v36 }
 0x1a4   : > { %796 = vmatpush1.bf16.msra.mxu0 %v669_v37  ;;  %1203 = vmatpush1.bf16.msra.mxu1 %v1063_v24 }
 0x1a5   : > { %v701_v38 = vpop.permute.xlu0 %700  ;;  %v703_v39 = vpop.permute.xlu1 %702  ;;  %1204 = vmatprep.subr.bf16.mxu1 %v2292_v13 }
 0x1a6   : > { %v705_v40 = vsel %vm447_vm6, %v701_v38, %v703_v39 }
 0x1a7   : > { %797 = vmatprep.subr.bf16.mxu0 %v705_v40 }
 0x1a8   : > { %1205 = vmatpush1.bf16.msra.mxu1 %v2302_v19  ;;  %v1649_v19 = vld [vmem:[%s2517_s3 + $0x14] ss:$8 sps:$4 sm:$0xff]  }
 0x1a9   : > { %v1111_v8 = vpop.permute.xlu0 %1110  ;;  %v1113_v42 = vpop.permute.xlu1 %1112 }
 0x1aa   : > { %v1115_v43 = vsel %vm447_vm6, %v1111_v8, %v1113_v42 }
 0x1ab   : > { %1206 = vmatprep.subr.bf16.mxu1 %v1115_v43 }
 0x1ad   : > { %v699_v44 = vpop.permute.xlu0 %698  ;;  %v1109_v45 = vpop.permute.xlu1 %1108 }
 0x1ae   : > { %v704_v5 = vsel %vm447_vm6, %v699_v44, %v701_v38  ;;  %v1114_v13 = vsel %vm447_vm6, %v1109_v45, %v1111_v8 }
 0x1af   : > { %798 = vmatpush1.bf16.msra.mxu0 %v704_v5  ;;  %1207 = vmatpush1.bf16.msra.mxu1 %v1114_v13 }
 0x1b2   : > { %814 = vmatmul.mubr.bf16.vlgmr.msra.gmra.mrb[0].mxu0 %v1646_v41  ;;  %1223 = vmatmul.mubr.bf16.vlgmr.msra.gmra.mrb[0].mxu1 %v1646_v41 }
 0x1b3   : > { %1519 = vmatprep.mubr.msk.bf16.mxu0 %vm489_vm12, %v1649_v19  ;;  %1535 = vmatprep.mubr.msk.bf16.mxu1 %vm489_vm12, %v1649_v19 }
 0x1ba   : > { %824 = vmatmul.mubr.bf16.gmra.mrb[4].mxu0 %v1651_v46  ;;  %1233 = vmatmul.mubr.bf16.gmra.mrb[4].mxu1 %v1651_v46 }
 0x1be   : > { %v744_v47 = vpop.permute.xlu1 %743  ;;  %v739_v48 = vpop.permute.xlu0 %738 }
 0x1c2   : > { %v1149_v49 = vpop.permute.xlu1 %1148  ;;  %v1154_v50 = vpop.permute.xlu0 %1153 }
 0x1c6   : > { %v749_v51 = vpop.permute.xlu1 %748  ;;  %v754_v16 = vpop.permute.xlu0 %753 }
 0x1ca   : > { %v1159_v18 = vpop.permute.xlu1 %1158  ;;  %v1164_v37 = vpop.permute.xlu0 %1163 }
 0x285   : > { %v815_v52 = vpop.f32.mrb[0].mxu0  ;;  %v1224_v56 = vpop.f32.mrb[0].mxu1 }
 0x286   : > { %v816_v53 = vadd.f32 %v815_v52, %v739_v48  ;;  %v817_v57 = vpop.f32.mrb[1].mxu0  ;;  %v1225_v58 = vadd.f32 %v1224_v56, %v1149_v49  ;;  %v1226_v62 = vpop.f32.mrb[1].mxu1 }
 0x287   : > { %v818_v59 = vadd.f32 %v817_v57, %v739_v48  ;;  %v819_v1 = vpop.f32.mrb[2].mxu0  ;;  %v1227_v3 = vadd.f32 %v1226_v62, %v1149_v49  ;;  %v1228_v6 = vpop.f32.mrb[2].mxu1 }
 0x288   : > { %v1520_v2 = vmul.f32 -1.442695, %v816_v53  ;;  %v820_v4 = vadd.f32 %v819_v1, %v744_v47  ;;  %v821_v55 = vpop.f32.mrb[3].mxu0  ;;  %v1536_v7 = vmul.f32 -1.442695, %v1225_v58  ;;  %v1229_v11 = vadd.f32 %v1228_v6, %v1154_v50  ;;  %v1230_v63 = vpop.f32.mrb[3].mxu1 }
 0x289   : > { %v1521_v9 = vmul.f32 -1.442695, %v818_v59  ;;  %v822_v54 = vadd.f32 %v821_v55, %v744_v47  ;;  %v1537_v12 = vmul.f32 -1.442695, %v1227_v3  ;;  %v1231_v14 = vadd.f32 %v1230_v63, %v1154_v50  ;;  %v872_v3 = vld [vmem:[%s317_s0] sm:$0xff]  ;;  %v1542_v55 = vld [vmem:[%s317_s0 + $0x10] sm:$0xff] }
 0x28a   : > { %1652 = vpow2.f32 %v1520_v2  ;;  %v1522_v61 = vmul.f32 -1.442695, %v820_v4  ;;  %v1538_v15 = vmul.f32 -1.442695, %v1229_v11  ;;  %v873_v11 = vld [vmem:[%s317_s0 + $0x8] sm:$0xff] }
 0x28b   : > { %1654 = vpow2.f32 %v1536_v7  ;;  %v1523_v17 = vmul.f32 -1.442695, %v822_v54  ;;  %v1539_v60 = vmul.f32 -1.442695, %v1231_v14  ;;  %v1543_v14 = vld [vmem:[%s317_s0 + $0x18] sm:$0xff] }
 0x28c   : > { %1656 = vpow2.f32 %v1521_v9 }
 0x28d   : > { %1658 = vpow2.f32 %v1537_v12  ;;  %v825_v0 = vpop.f32.mrb[4].mxu0  ;;  %v1234_v21 = vpop.f32.mrb[4].mxu1 }
 0x28e   : > { %1660 = vpow2.f32 %v1522_v61  ;;  %v826_v20 = vadd.f32 %v825_v0, %v749_v51  ;;  %v827_v26 = vpop.f32.mrb[5].mxu0  ;;  %v1235_v27 = vadd.f32 %v1234_v21, %v1159_v18  ;;  %v1236_v28 = vpop.f32.mrb[5].mxu1 }
 0x28f   : > { %1662 = vpow2.f32 %v1538_v15  ;;  %v829_v23 = vpop.f32.mrb[6].mxu0  ;;  %v828_v29 = vadd.f32 %v827_v26, %v749_v51  ;;  %v1238_v32 = vpop.f32.mrb[6].mxu1  ;;  %v1237_v33 = vadd.f32 %v1236_v28, %v1159_v18 }
 0x290   : > { %1664 = vpow2.f32 %v1523_v17  ;;  %v830_v30 = vadd.f32 %v829_v23, %v754_v16  ;;  %v831_v22 = vpop.f32.mrb[7].mxu0  ;;  %v1240_v25 = vpop.f32.mrb[7].mxu1  ;;  %v1239_v8 = vadd.f32 %v1238_v32, %v1164_v37 }
 0x291   : > { %1666 = vpow2.f32 %v1539_v60  ;;  %v832_v44 = vadd.f32 %v831_v22, %v754_v16  ;;  %v1241_v41 = vadd.f32 %v1240_v25, %v1164_v37 }
 0x292   : > { %1668 = vtanh.f32 %v826_v20  ;;  %v1524_v34 = vmul.f32 -1.442695, %v830_v30  ;;  %v1540_v48 = vmul.f32 -1.442695, %v1239_v8 }
 0x293   : > { %1670 = vtanh.f32 %v1235_v27  ;;  %v1525_v51 = vmul.f32 -1.442695, %v832_v44  ;;  %v1541_v53 = vmul.f32 -1.442695, %v1241_v41 }
 0x294   : > { %v1653_v31 = vpop.eup %1652  ;;  %1672 = vtanh.f32 %v828_v29 }
 0x295   : > { %v1655_v35 = vpop.eup %1654  ;;  %v840_v24 = vadd.f32 1.0, %v1653_v31  ;;  %1674 = vtanh.f32 %v1237_v33 }
 0x296   : > { %v1657_v36 = vpop.eup %1656  ;;  %v1249_v38 = vadd.f32 1.0, %v1655_v35  ;;  %1676 = vpow2.f32 %v1524_v34 }
 0x297   : > { %v1659_v39 = vpop.eup %1658  ;;  %1678 = vrcp.f32 %v840_v24  ;;  %v841_v40 = vadd.f32 1.0, %v1657_v36 }
 0x298   : > { %v1661_v42 = vpop.eup %1660  ;;  %1680 = vrcp.f32 %v1249_v38  ;;  %v1250_v43 = vadd.f32 1.0, %v1659_v39 }
 0x299   : > { %v1663_v45 = vpop.eup %1662  ;;  %1682 = vrcp.f32 %v841_v40  ;;  %v852_v5 = vadd.f32 1.0, %v1661_v42 }
 0x29a   : > { %v1665_v13 = vpop.eup %1664  ;;  %1684 = vrcp.f32 %v1250_v43  ;;  %v1261_v19 = vadd.f32 1.0, %v1663_v45 }
 0x29b   : > { %v1667_v46 = vpop.eup %1666  ;;  %1686 = vrcp.f32 %v852_v5  ;;  %v853_v47 = vadd.f32 1.0, %v1665_v13 }
 0x29c   : > { %v1669_v49 = vpop.eup %1668  ;;  %1688 = vrcp.f32 %v1261_v19  ;;  %v1262_v50 = vadd.f32 1.0, %v1667_v46 }
 0x29d   : > { %v1671_v52 = vpop.eup %1670  ;;  %1690 = vrcp.f32 %v853_v47 }
 0x29e   : > { %v1673_v56 = vpop.eup %1672  ;;  %1692 = vrcp.f32 %v1262_v50 }
 0x29f   : > { %v1675_v57 = vpop.eup %1674  ;;  %1694 = vpow2.f32 %v1540_v48 }
 0x2a0   : > { %v1677_v58 = vpop.eup %1676  ;;  %1696 = vpow2.f32 %v1525_v51 }
 0x2a1   : > { %v1679_v59 = vpop.eup %1678  ;;  %1698 = vpow2.f32 %v1541_v53  ;;  %v866_v63 = vadd.f32 1.0, %v1677_v58 }
 0x2a2   : > { %v1681_v62 = vpop.eup %1680  ;;  %v876_v1 = vmul.f32 %v1679_v59, %v1669_v49 }
 0x2a3   : > { %v1683_v2 = vpop.eup %1682  ;;  %v1286_v4 = vmul.f32 %v1681_v62, %v1671_v52  ;;  %1700 = vrcp.f32 %v866_v63 }
 0x2a4   : > { %v1685_v6 = vpop.eup %1684  ;;  %v877_v7 = vmul.f32 %v1683_v2, %v1673_v56 }
 0x2a5   : > { %v1687_v9 = vpop.eup %1686  ;;  %v1287_v54 = vmul.f32 %v1685_v6, %v1675_v57 }
 0x2a6   : > { %v1689_v12 = vpop.eup %1688  ;;  %v874_v61 = vmul.f32 %v1687_v9, %v872_v3 }
 0x2a7   : > { %v1691_v15 = vpop.eup %1690  ;;  %v1284_v16 = vmul.f32 %v1689_v12, %v1542_v55 }
 0x2a8   : > { %v1693_v17 = vpop.eup %1692  ;;  %v875_v18 = vmul.f32 %v1691_v15, %v873_v11  ;;  %v878_v60 = vadd.f32 %v876_v1, %v874_v61 }
 0x2a9   : > { %v1695_v0 = vpop.eup %1694  ;;  %v1285_v20 = vmul.f32 %v1693_v17, %v1543_v14  ;;  %v1288_v21 = vadd.f32 %v1286_v4, %v1284_v16 }
 0x2aa   : > { %v1697_v26 = vpop.eup %1696  ;;  %1702 = vtanh.f32 %v878_v60  ;;  %890 = vst [vmem:[%s360_s14] sm:$0xff] %v878_v60  ;;  %v879_v27 = vadd.f32 %v877_v7, %v875_v18  ;;  %v1275_v28 = vadd.f32 1.0, %v1695_v0 }
 0x2ab   : > { %v1699_v23 = vpop.eup %1698  ;;  %1704 = vtanh.f32 %v1288_v21  ;;  %1548 = vst [vmem:[%s360_s14 + $0x10] sm:$0xff] %v1288_v21  ;;  %v1289_v29 = vadd.f32 %v1287_v54, %v1285_v20  ;;  %v867_v30 = vadd.f32 1.0, %v1697_v26 }
 0x2ac   : > { %1706 = vtanh.f32 %v879_v27  ;;  %891 = vst [vmem:[%s360_s14 + $0x8] sm:$0xff] %v879_v27  ;;  %v1276_v32 = vadd.f32 1.0, %v1699_v23 }
 0x2ad   : > { %1708 = vtanh.f32 %v1289_v29  ;;  %1549 = vst [vmem:[%s360_s14 + $0x18] sm:$0xff] %v1289_v29 }
 0x2ae   : > { %1710 = vrcp.f32 %v1275_v28 }
 0x2af   : > { %1819 = shalt.err (!%p1816_p10)
}
 0x2b0   : > { %s1820_s29 = scalar_lea.hbm %s2424_s30, 512  ;;  %s1824_s0 = scalar_lea.hbm %s2520_s6, 1024 }
 0x2b1   : > { %p1821_p11 = scmp.ne.s32.totalorder %s2424_s30, %s1820_s29  ;;  %p1825_p5 = scmp.lt.u32.totalorder %s2424_s30, %s2520_s6 }
 0x2b2   : > { %p1826_p2 = scmp.lt.u32.totalorder %s1824_s0, %s1820_s29  ;;  %p1828_p13 = scmp.lt.u32.totalorder %s1820_s29, %s2424_s30 }
 0x2b3   : > { %p1822_p4 = pnand %p1821_p11, %p2548_p7 }
 0x2b4   : > { %p1827_p1 = por %p1826_p2, %p1825_p5 }
 0x2b5   : > { %p1823_p3 = pneg %p1822_p4 }
 0x2b6   : > { %p1829_p6 = por %p1828_p13, %p1827_p1 }
 0x2b8   : > { %p1830_p9 = pnand %p1829_p6, %p1823_p3 }
 0x2ba   : > { %1833 = shalt.err (!%p1830_p9)
}
 0x2bb   : > { %s1926_s15 = smov 256   ;;  %1712 = vrcp.f32 %v867_v30  ;;  %v1701_v22 = vpop.eup %1700  ;;  %v884_v25 = vld [vmem:[%s2162_s27] sm:$0xff]  ;;  %s353_s26 = scalar_lea.vmem [#allocation10], %s2158_s10  ;;  %v885_v40 = vld [vmem:[%s2162_s27 + $0x8] sm:$0xff]  ;;  %v1545_v43 = vld [vmem:[%s2162_s27 + $0x18] sm:$0xff] }
 0x2bc   : > { %1577 = dma.vmem_to_hbm [thread:$0]  (%p2548_p7), %s2426_s13, 512, %s2424_s30, %s1310_s7, %s1926_s15, %s1926_s15, %s1922_s19   ;;  %1714 = vrcp.f32 %v1276_v32  ;;  %v1703_v33 = vpop.eup %1702 }
 0x2bd   : > { %v1705_v34 = vpop.eup %1704  ;;  %v882_v31 = vmul.f32 %v1703_v33, %v1701_v22  ;;  %s1324_s13 = sshll.u32 %s353_s26, 4  ;;  %s2465_s10 = scalar_lea.hbm %s2519_s5, %s1567_s16  ;;  %s2467_s13 = int_to_ptr.vmem [resolvable:$true] %s1324_s13 }
 0x2be   : > { %v1707_v35 = vpop.eup %1706  ;;  %s1305_s27 = scalar_lea.sflag [#allocation6], %s2155_s28  ;;  %s1834_s17 = scalar_lea.vmem %s2467_s13, 512 }
 0x2bf   : > { %v1709_v24 = vpop.eup %1708  ;;  %v886_v36 = vadd.f32 %v884_v25, %v882_v31  ;;  %p1835_p12 = scmp.ne.s32.totalorder %s2467_s13, %s1834_s17  ;;  %s1927_s18 = smov [#allocation10]  }
 0x2c0   : > { %v1711_v37 = vpop.eup %1710  ;;  %s1838_s25 = sshll.u32 %s1927_s18, 4  ;;  %s1839_s25 = int_to_ptr.vmem [resolvable:$false] %s1838_s25 }
 0x2c1   : > { %888 = vst [vmem:[%s353_s26] sm:$0xff] %v886_v36  ;;  %v1292_v39 = vmul.f32 %v1711_v37, %v1705_v34  ;;  %p1836_p0 = pnand %p1835_p12, %p2548_p7  ;;  %s1840_s1 = scalar_lea.vmem %s1839_s25, 1024 }
 0x2c2   : > { %p1841_p10 = scmp.lt.s32.totalorder %s2467_s13, %s1839_s25  ;;  %p1842_p11 = scmp.lt.s32.totalorder %s1840_s1, %s1834_s17 }
 0x2c3   : > { %v1296_v44 = vadd.f32 %v2179_v10, %v1292_v39  ;;  %p1837_p8 = pneg %p1836_p0 }
 0x2c4   : > { %p1843_p4 = por %p1842_p11, %p1841_p10 }
 0x2c5   : > { %v1713_v38 = vpop.eup %1712  ;;  %1546 = vst [vmem:[%s353_s26 + $0x10] sm:$0xff] %v1296_v44 }
 0x2c6   : > { %v1715_v8 = vpop.eup %1714  ;;  %v883_v42 = vmul.f32 %v1713_v38, %v1707_v35  ;;  %p1844_p3 = pnand %p1843_p4, %p1837_p8 }
 0x2c7   : > { %v1293_v45 = vmul.f32 %v1715_v8, %v1709_v24 }
 0x2c8   : > { %v887_v5 = vadd.f32 %v885_v40, %v883_v42 }
 0x2c9   : > { %v1297_v41 = vadd.f32 %v1545_v43, %v1293_v45 }
 0x2ca   : > { %889 = vst [vmem:[%s353_s26 + $0x8] sm:$0xff] %v887_v5 }
 0x2cb   : > { %1547 = vst [vmem:[%s353_s26 + $0x18] sm:$0xff] %v1297_v41 }
 0x2cc   : > { %1847 = shalt.err (!%p1844_p3)
}
 0x2cd   : > { %s1848_s16 = scalar_lea.hbm %s2465_s10, 512  ;;  %s1852_s12 = scalar_lea.hbm %s2519_s5, 1024 }
 0x2ce   : > { %p1849_p5 = scmp.ne.s32.totalorder %s2465_s10, %s1848_s16  ;;  %p1853_p13 = scmp.lt.u32.totalorder %s2465_s10, %s2519_s5 }
 0x2cf   : > { %p1854_p6 = scmp.lt.u32.totalorder %s1852_s12, %s1848_s16  ;;  %p1856_p12 = scmp.lt.u32.totalorder %s1848_s16, %s2465_s10 }
 0x2d0   : > { %p1850_p2 = pnand %p1849_p5, %p2548_p7 }
 0x2d1   : > { %p1855_p9 = por %p1854_p6, %p1853_p13 }
 0x2d2   : > { %p1851_p1 = pneg %p1850_p2 }
 0x2d3   : > { %p1857_p0 = por %p1856_p12, %p1855_p9 }
 0x2d5   : > { %p1858_p8 = pnand %p1857_p0, %p1851_p1 }
 0x2d7   : > { %1861 = shalt.err (!%p1858_p8)
}
 0x2d8   : > { %1576 = dma.vmem_to_hbm [thread:$0]  (%p2548_p7), %s2467_s13, 512, %s2465_s10, %s1305_s27, %s1926_s15, %s1926_s15, %s1922_s19  }
 0x2d9 PF: > { %s1356_s20 = sand.u32 1, %s1896_s21   ;;  %p2549_p10 = scmp.ne.s32.totalorder %s2536_s9, 0 }
 0x2da   : > { %p2550_p11 = scmp.ge.s32.totalorder %s1908_s24, 2  ;;  %s1357_s26 = scalar_lea.sflag [#allocation6], %s1356_s20 }
 0x2dc   : > { %p1591_p4 = pnand %p2550_p11, %p2549_p10 }
 0x2de   : > { %1887 = dma.done.wait (!%p1591_p4), %s1357_s26, 512  }
 0x2df   : > { %1889 = vsyncadd (!%p1591_p4), %s1357_s26, 4294966784  ;;  %s1366_s8 = scalar_lea.sflag [#allocation12], %s1356_s20 }
 0x2e0   : > { %1891 = dma.done.wait (!%p1591_p4), %s1366_s8, 512  }
 0x2e1   : > { %1893 = vsyncadd (!%p1591_p4), %s1366_s8, 4294966784  ;;  %s2551_s24 = sld [smem:[#allocation17_spill]]  ;;  %s2552_s28 = sld [smem:[#allocation18_spill]] }
 0x2e2   : > { %s2553_s21 = smov %s1900_s22  ;;  %s2554_s22 = smov %s1904_s23 }
 0x2e7   : > { %p26_p7 = scmp.ge.s32.totalorder %s2551_s24, 4   ;;  %s2555_s23 = smov %s2552_s28 }
 0x2e9   :  { %28 = sbr.rel (!%p26_p7) target bundleno = 12 (0xc), region = 131 }
 0x2f0   :  { %1371 = vsyncpa [#allocation5], 1 }
 0x2f1   :  { %1373 = vsyncpa [#allocation5 + $0x1], 1 }
 0x2f2   :  { %1374 = vsyncpa [#allocation8], 1 }
 0x2f3   :  { %1376 = vsyncpa [#allocation8 + $0x1], 1 }
 0x2f4   :  { %1377 = vsyncpa [#allocation6], 1 }
 0x2f5   :  { %1379 = vsyncpa [#allocation6 + $0x1], 1 }
 0x2f6   :  { %1380 = vsyncpa [#allocation12], 1 }
 0x2f7   :  { %1382 = vsyncpa [#allocation12 + $0x1], 1 }

</bundles_post_ra>
